<compile_context>
chip_gen: v7x
topology: tpu7x:2x2x1
jax: 0.10.0
libtpu: 0.0.40
codegen_flags: <defaults>
</compile_context>

<pallas_src>
import jax
import jax.numpy as jnp
from jax import lax
from jax.experimental import pallas as pl
from jax.experimental.pallas import tpu as pltpu

_LANE = 128
_SUBLANE = 8

# PyTorch LSTM gate order is (i, f, g, o); kernel uses (i, f, o, g) so all
# sigmoid gates are contiguous.
_GATE_PERM = (0, 1, 3, 2)


def _round_up(x, m):
    return (x + m - 1) // m * m


def _textrnn_kernel(x_ref,      # (T, Bp, E)   embedded inputs, f32 (batch-padded)
                    h0_ref,     # (Bp, Hp)     initial hidden (padded), f32
                    c0_ref,     # (Bp, Hp)     initial cell   (padded), f32
                    wx_ref,     # (E, 4*Hp)    stacked W_ih^T, bf16, gate-lane-aligned
                    wh_ref,     # (Hp, 4*Hp)   stacked W_hh^T, bf16, gate-lane-aligned
                    b_ref,      # (1, 4*Hp)    b_ih + b_hh (padded), f32
                    wfc_ref,    # (Hp, Vp)     W_fc^T (padded rows/cols), bf16
                    bfc_ref,    # (1, Vp)      f32
                    y_ref,      # (T, Bp, Vp)  logits out (lane-dense), f32
                    ht_ref,     # (Bp, Hp)     final hidden out, f32
                    ct_ref,     # (Bp, Hp)     final cell out, f32
                    xw_s,       # scratch (T, Bp, 4*Hp) f32  precomputed input proj
                    h_all_s):   # scratch (T, Bp, Hp)   f32  per-step hidden states
    T, Bp, E = x_ref.shape
    Hp = wh_ref.shape[0]
    Vp = wfc_ref.shape[-1]

    # ---- 1) Batched input projection for all timesteps (off the serial path).
    #         bf16 operands, f32 accumulation.
    x_all = x_ref[...].reshape(T * Bp, E).astype(jnp.bfloat16)
    xw = jnp.dot(x_all, wx_ref[...], preferred_element_type=jnp.float32)
    xw_s[...] = (xw + b_ref[...]).reshape(T, Bp, 4 * Hp)

    # Full unroll only for small T; partial unroll keeps scheduler visibility
    # without exploding code size / live ranges at large T.
    unroll = True if T <= 16 else 8

    # ---- 2) Sequential LSTM recurrence; only the h-dependent matmul per step.
    #         wh_ref is loaded inside the loop body (not hoisted into vregs).
    def step(t, carry):
        h_prev, c_prev = carry
        gates = xw_s[t] + jnp.dot(h_prev.astype(jnp.bfloat16), wh_ref[...],
                                  preferred_element_type=jnp.float32)
        # Gate order (pre-permuted in the wrapper): i, f, o, g.  Each slice is
        # lane-aligned (Hp is a multiple of 128).
        sig = jax.nn.sigmoid(gates[:, :3 * Hp])
        i_g = sig[:, 0 * Hp:1 * Hp]
        f_g = sig[:, 1 * Hp:2 * Hp]
        o_g = sig[:, 2 * Hp:3 * Hp]
        g_g = jnp.tanh(gates[:, 3 * Hp:4 * Hp])
        c_new = f_g * c_prev + i_g * g_g
        h_new = o_g * jnp.tanh(c_new)
        h_all_s[t] = h_new
        return h_new, c_new

    h_fin, c_fin = lax.fori_loop(0, T, step, (h0_ref[...], c0_ref[...]),
                                 unroll=unroll)

    # ---- 3) Final states written exactly once.
    ht_ref[...] = h_fin
    ct_ref[...] = c_fin

    # Dropout(p=0.2) in eval mode is identity.
    # TODO(synk): training-mode dropout (Bernoulli mask + 1/(1-p) scale) not applied.

    # ---- 4) Batched fc projection over all T*B rows (off the serial path).
    #         bf16 operands, f32 accumulation, lane-dense (Vp) store.
    h_flat = h_all_s[...].reshape(T * Bp, Hp).astype(jnp.bfloat16)
    logits = jnp.dot(h_flat, wfc_ref[...],
                     preferred_element_type=jnp.float32) + bfc_ref[...]
    y_ref[...] = logits.reshape(T, Bp, Vp).astype(y_ref.dtype)


def _prep_params(w_ih, w_hh, b_ih, b_hh, w_fc, b_fc, H, E, V, Hp, Vp):
    """Pre-transpose / pad / reorder / cast weights so the kernel needs no
    in-kernel transposes, every gate occupies a lane-aligned block of width Hp,
    sigmoid gates are contiguous (i,f,o,g), matmul operands are bf16, and the
    fc output is lane-dense (width Vp)."""
    perm = jnp.array(_GATE_PERM)
    pad_h = Hp - H
    pad_v = Vp - V
    # W_ih: (4H, E) -> (4, H, E), reorder gates, transpose -> (E, 4, H),
    # pad H->Hp -> (E, 4*Hp)
    wx = w_ih.reshape(4, H, E)[perm]
    wx = jnp.transpose(wx, (2, 0, 1))
    wx = jnp.pad(wx, ((0, 0), (0, 0), (0, pad_h))).reshape(E, 4 * Hp)
    # W_hh: (4H, H) -> (4, H_out, H_in), reorder gates, -> (H_in, 4, H_out),
    # pad both H dims -> (Hp, 4*Hp)
    wh = w_hh.reshape(4, H, H)[perm]
    wh = jnp.transpose(wh, (2, 0, 1))
    wh = jnp.pad(wh, ((0, pad_h), (0, 0), (0, pad_h))).reshape(Hp, 4 * Hp)
    # Pre-summed bias, reordered and per-gate padded: (1, 4*Hp)  (kept f32)
    b = (b_ih + b_hh).reshape(4, H)[perm]
    b = jnp.pad(b, ((0, 0), (0, pad_h))).reshape(1, 4 * Hp)
    # W_fc: (V, H) -> W_fc^T padded to (Hp, Vp); bias padded to (1, Vp)
    wfc = jnp.pad(w_fc.T, ((0, pad_h), (0, pad_v)))
    bfc = jnp.pad(b_fc, (0, pad_v)).reshape(1, Vp)
    return (wx.astype(jnp.bfloat16), wh.astype(jnp.bfloat16), b,
            wfc.astype(jnp.bfloat16), bfc)


def text_rnn_forward(token_ids, hidden, params):
    """token_ids: (T, B, 1) int32, hidden: (h0, c0) each (1, B, H)."""
    emb_table, w_ih, w_hh, b_ih, b_hh, w_fc, b_fc = params
    h0, c0 = hidden
    assert h0.shape[0] == 1 and c0.shape[0] == 1
    # TODO(synk): only n_layers == 1 is supported (matches the module default).

    T, B, _ = token_ids.shape
    V, E = emb_table.shape
    H = h0.shape[-1]
    Hp = _round_up(H, _LANE)      # lane-aligned gate blocks
    Bp = _round_up(B, _SUBLANE)   # sublane-aligned batch
    Vp = _round_up(V, _LANE)      # lane-dense logits

    # Embedding lookup + squeeze(2) -> (T, B, E); gather stays in the XLA glue.
    # TODO(synk): at production sizes, move the gather in-kernel (scalar-prefetch
    #   token ids + DMA gather) to avoid the HBM round-trip of x_emb.
    x_emb = jnp.take(emb_table, token_ids[..., 0], axis=0)
    x_pad = jnp.pad(x_emb, ((0, 0), (0, Bp - B), (0, 0)))

    h0p = jnp.pad(h0[0], ((0, Bp - B), (0, Hp - H)))
    c0p = jnp.pad(c0[0], ((0, Bp - B), (0, Hp - H)))

    wx, wh, b, wfc, bfc = _prep_params(w_ih, w_hh, b_ih, b_hh, w_fc, b_fc,
                                       H, E, V, Hp, Vp)

    # Advisory cost estimate (dominated by the two batched projections).
    flops = 2 * T * Bp * (E * 4 * Hp + Hp * 4 * Hp + Hp * Vp)
    transcendentals = T * Bp * 5 * Hp        # 3 sigmoid + 2 tanh vregs / step
    bytes_accessed = (
        4 * (T * Bp * E + 2 * Bp * Hp + 4 * Hp + Vp          # f32 inputs
             + T * Bp * Vp + 2 * Bp * Hp)                     # f32 outputs
        + 2 * (E * 4 * Hp + Hp * 4 * Hp + Hp * Vp))           # bf16 weights
    cost = pl.CostEstimate(flops=flops, transcendentals=transcendentals,
                           bytes_accessed=bytes_accessed)

    # Explicit VMEM budget: everything is resident (no grid), so account for
    # all operands + outputs + scratch, with headroom.
    vmem_needed = (
        4 * (T * Bp * E + 2 * Bp * Hp + 4 * Hp + Vp)          # f32 inputs
        + 2 * (E * 4 * Hp + Hp * 4 * Hp + Hp * Vp)            # bf16 weights
        + 4 * (T * Bp * Vp + 2 * Bp * Hp)                     # f32 outputs
        + 4 * (T * Bp * 4 * Hp + T * Bp * Hp))                # f32 scratch
    vmem_limit = int(min(64 * 1024 * 1024,
                         max(2 * vmem_needed, 4 * 1024 * 1024)))

    y_pad, ht_pad, ct_pad = pl.pallas_call(
        _textrnn_kernel,
        out_shape=(
            jax.ShapeDtypeStruct((T, Bp, Vp), jnp.float32),
            jax.ShapeDtypeStruct((Bp, Hp), jnp.float32),
            jax.ShapeDtypeStruct((Bp, Hp), jnp.float32),
        ),
        scratch_shapes=[
            pltpu.VMEM((T, Bp, 4 * Hp), jnp.float32),   # precomputed input proj
            pltpu.VMEM((T, Bp, Hp), jnp.float32),       # all hidden states
        ],
        compiler_params=pltpu.CompilerParams(vmem_limit_bytes=vmem_limit),
        cost_estimate=cost,
    )(x_pad, h0p, c0p, wx, wh, b, wfc, bfc)

    y = y_pad[:, :B, :V]
    ht = ht_pad[:B, :H][None]
    ct = ct_pad[:B, :H][None]
    return y, (ht, ct)


def _reference_forward(token_ids, hidden, params):
    """Pure-JAX f32 reference (lax.scan LSTM) for correctness checking."""
    emb_table, w_ih, w_hh, b_ih, b_hh, w_fc, b_fc = params
    h0, c0 = hidden
    H = h0.shape[-1]
    x_emb = jnp.take(emb_table, token_ids[..., 0], axis=0)  # (T, B, E)

    def step(carry, x_t):
        h, c = carry
        gates = x_t @ w_ih.T + b_ih + h @ w_hh.T + b_hh
        i = jax.nn.sigmoid(gates[:, 0 * H:1 * H])
        f = jax.nn.sigmoid(gates[:, 1 * H:2 * H])
        g = jnp.tanh(gates[:, 2 * H:3 * H])
        o = jax.nn.sigmoid(gates[:, 3 * H:4 * H])
        c_new = f * c + i * g
        h_new = o * jnp.tanh(c_new)
        return (h_new, c_new), h_new

    (hT, cT), outs = lax.scan(step, (h0[0], c0[0]), x_emb)
    y = outs @ w_fc.T + b_fc
    return y, (hT[None], cT[None])


if __name__ == "__main__":
    # Small shapes consistent with the module.
    input_size = 32      # vocab size V
    hidden_size = 32     # H
    embedding_size = 16  # E
    n_layers = 1
    seq_len = 8
    batch = 4

    key = jax.random.PRNGKey(0)
    k = jax.random.split(key, 8)

    scale = 0.1
    emb_table = scale * jax.random.normal(k[0], (input_size, embedding_size), jnp.float32)
    w_ih = scale * jax.random.normal(k[1], (4 * hidden_size, embedding_size), jnp.float32)
    w_hh = scale * jax.random.normal(k[2], (4 * hidden_size, hidden_size), jnp.float32)
    b_ih = scale * jax.random.normal(k[3], (4 * hidden_size,), jnp.float32)
    b_hh = scale * jax.random.normal(k[4], (4 * hidden_size,), jnp.float32)
    w_fc = scale * jax.random.normal(k[5], (input_size, hidden_size), jnp.float32)
    b_fc = scale * jax.random.normal(k[6], (input_size,), jnp.float32)
    params = (emb_table, w_ih, w_hh, b_ih, b_hh, w_fc, b_fc)

    token_ids = jax.random.randint(k[7], (seq_len, batch, 1), 0, input_size, jnp.int32)
    h0 = jnp.zeros((n_layers, batch, hidden_size), jnp.float32)
    c0 = jnp.zeros((n_layers, batch, hidden_size), jnp.float32)

    y, (ht, ct) = text_rnn_forward(token_ids, (h0, c0), params)
    jax.block_until_ready((y, ht, ct))

    y_ref, (ht_ref, ct_ref) = _reference_forward(token_ids, (h0, c0), params)
    assert y.shape == (seq_len, batch, input_size)
    assert ht.shape == (n_layers, batch, hidden_size)
    assert ct.shape == (n_layers, batch, hidden_size)
    # bf16 MXU operands (f32 accumulation) vs. f32 reference -> slightly looser
    # tolerances than the bit-tight f32 version.
    assert jnp.allclose(y, y_ref, rtol=1e-2, atol=1e-2)
    assert jnp.allclose(ht, ht_ref, rtol=1e-2, atol=1e-2)
    assert jnp.allclose(ct, ct_ref, rtol=1e-2, atol=1e-2)

    print("KERNEL_OK")
</pallas_src>

<mosaic_0001>
module attributes {stable_mosaic.version = 11 : i64} {
  func.func @_textrnn_kernel(%arg0: memref<8x8x16xf32, #tpu.memory_space<vmem>>, %arg1: memref<8x128xf32, #tpu.memory_space<vmem>>, %arg2: memref<8x128xf32, #tpu.memory_space<vmem>>, %arg3: memref<16x512xbf16, #tpu.memory_space<vmem>>, %arg4: memref<128x512xbf16, #tpu.memory_space<vmem>>, %arg5: memref<1x512xf32, #tpu.memory_space<vmem>>, %arg6: memref<128x128xbf16, #tpu.memory_space<vmem>>, %arg7: memref<1x128xf32, #tpu.memory_space<vmem>>, %arg8: memref<8x8x128xf32, #tpu.memory_space<vmem>>, %arg9: memref<8x128xf32, #tpu.memory_space<vmem>>, %arg10: memref<8x128xf32, #tpu.memory_space<vmem>>, %arg11: memref<8x8x512xf32, #tpu.memory_space<vmem>>, %arg12: memref<8x8x128xf32, #tpu.memory_space<vmem>>) attributes {dimension_semantics = [], scalar_prefetch = 0 : i64, scratch_operands = 2 : i64, tpu.core_type = #tpu.core_type<tc>} {
    %c0 = arith.constant 0 : index
    %c0_0 = arith.constant 0 : index
    %c0_1 = arith.constant 0 : index
    %0 = vector.load %arg0[%c0, %c0_0, %c0_1] : memref<8x8x16xf32, #tpu.memory_space<vmem>>, vector<8x8x16xf32>
    %1 = vector.shape_cast %0 : vector<8x8x16xf32> to vector<64x16xf32>
    %2 = arith.truncf %1 : vector<64x16xf32> to vector<64x16xbf16>
    %c0_2 = arith.constant 0 : index
    %c0_3 = arith.constant 0 : index
    %3 = vector.load %arg3[%c0_2, %c0_3] : memref<16x512xbf16, #tpu.memory_space<vmem>>, vector<16x512xbf16>
    %cst = arith.constant dense<0.000000e+00> : vector<64x512xf32>
    %4 = tpu.matmul %2, %3, %cst {dimension_numbers = #tpu.dot_dimension_numbers<[1], [0], [0], [1], [0, 0, 1, 1], [], []>} : vector<64x16xbf16>, vector<16x512xbf16>, vector<64x512xf32> -> vector<64x512xf32>
    %c0_4 = arith.constant 0 : index
    %c0_5 = arith.constant 0 : index
    %5 = vector.load %arg5[%c0_4, %c0_5] : memref<1x512xf32, #tpu.memory_space<vmem>>, vector<1x512xf32>
    %6 = vector.broadcast %5 : vector<1x512xf32> to vector<64x512xf32>
    %7 = arith.addf %4, %6 : vector<64x512xf32>
    %8 = vector.shape_cast %7 : vector<64x512xf32> to vector<8x8x512xf32>
    %c0_6 = arith.constant 0 : index
    %c0_7 = arith.constant 0 : index
    %c0_8 = arith.constant 0 : index
    %9 = vector.load %arg11[%c0_6, %c0_7, %c0_8] : memref<8x8x512xf32, #tpu.memory_space<vmem>>, vector<8x8x512xf32>
    tpu.vector_store %arg11[%c0_6, %c0_7, %c0_8], %8 {strides = array<i32>} : memref<8x8x512xf32, #tpu.memory_space<vmem>>, vector<8x8x512xf32>,
    %c0_9 = arith.constant 0 : index
    %c0_10 = arith.constant 0 : index
    %10 = vector.load %arg1[%c0_9, %c0_10] : memref<8x128xf32, #tpu.memory_space<vmem>>, vector<8x128xf32>
    %c0_11 = arith.constant 0 : index
    %c0_12 = arith.constant 0 : index
    %11 = vector.load %arg2[%c0_11, %c0_12] : memref<8x128xf32, #tpu.memory_space<vmem>>, vector<8x128xf32>
    %c0_i32 = arith.constant 0 : i32
    %12 = arith.index_cast %c0_i32 : i32 to index
    %c0_13 = arith.constant 0 : index
    %c0_14 = arith.constant 0 : index
    %13 = vector.load %arg11[%12, %c0_13, %c0_14] : memref<8x8x512xf32, #tpu.memory_space<vmem>>, vector<1x8x512xf32>
    %14 = vector.shape_cast %13 : vector<1x8x512xf32> to vector<8x512xf32>
    %15 = arith.truncf %10 : vector<8x128xf32> to vector<8x128xbf16>
    %c0_15 = arith.constant 0 : index
    %c0_16 = arith.constant 0 : index
    %16 = vector.load %arg4[%c0_15, %c0_16] : memref<128x512xbf16, #tpu.memory_space<vmem>>, vector<128x512xbf16>
    %cst_17 = arith.constant dense<0.000000e+00> : vector<8x512xf32>
    %17 = tpu.matmul %15, %16, %cst_17 {dimension_numbers = #tpu.dot_dimension_numbers<[1], [0], [0], [1], [0, 0, 1, 1], [], []>} : vector<8x128xbf16>, vector<128x512xbf16>, vector<8x512xf32> -> vector<8x512xf32>
    %18 = arith.addf %14, %17 : vector<8x512xf32>
    %19 = vector.extract_strided_slice %18 {offsets = [0, 0], sizes = [8, 384], strides = [1, 1]} : vector<8x512xf32> to vector<8x384xf32>
    %20 = arith.negf %19 : vector<8x384xf32>
    %21 = math.exp %20 : vector<8x384xf32>
    %cst_18 = arith.constant 1.000000e+00 : f32
    %22 = vector.broadcast %cst_18 : f32 to vector<8x384xf32>
    %23 = arith.addf %22, %21 : vector<8x384xf32>
    %24 = arith.divf %22, %23 : vector<8x384xf32>
    %25 = vector.extract_strided_slice %24 {offsets = [0, 0], sizes = [8, 128], strides = [1, 1]} : vector<8x384xf32> to vector<8x128xf32>
    %26 = vector.extract_strided_slice %24 {offsets = [0, 128], sizes = [8, 128], strides = [1, 1]} : vector<8x384xf32> to vector<8x128xf32>
    %27 = vector.extract_strided_slice %24 {offsets = [0, 256], sizes = [8, 128], strides = [1, 1]} : vector<8x384xf32> to vector<8x128xf32>
    %28 = vector.extract_strided_slice %18 {offsets = [0, 384], sizes = [8, 128], strides = [1, 1]} : vector<8x512xf32> to vector<8x128xf32>
    %29 = math.tanh %28 : vector<8x128xf32>
    %30 = arith.mulf %26, %11 : vector<8x128xf32>
    %31 = arith.mulf %25, %29 : vector<8x128xf32>
    %32 = arith.addf %30, %31 : vector<8x128xf32>
    %33 = math.tanh %32 : vector<8x128xf32>
    %34 = arith.mulf %27, %33 : vector<8x128xf32>
    %35 = arith.index_cast %c0_i32 : i32 to index
    %c0_19 = arith.constant 0 : index
    %c0_20 = arith.constant 0 : index
    %36 = vector.load %arg12[%35, %c0_19, %c0_20] : memref<8x8x128xf32, #tpu.memory_space<vmem>>, vector<1x8x128xf32>
    %37 = vector.shape_cast %36 : vector<1x8x128xf32> to vector<8x128xf32>
    %38 = vector.shape_cast %34 : vector<8x128xf32> to vector<1x8x128xf32>
    tpu.vector_store %arg12[%35, %c0_19, %c0_20], %38 {strides = array<i32>} : memref<8x8x128xf32, #tpu.memory_space<vmem>>, vector<1x8x128xf32>,
    %c1_i32 = arith.constant 1 : i32
    %39 = arith.index_cast %c1_i32 : i32 to index
    %c0_21 = arith.constant 0 : index
    %c0_22 = arith.constant 0 : index
    %40 = vector.load %arg11[%39, %c0_21, %c0_22] : memref<8x8x512xf32, #tpu.memory_space<vmem>>, vector<1x8x512xf32>
    %41 = vector.shape_cast %40 : vector<1x8x512xf32> to vector<8x512xf32>
    %42 = arith.truncf %34 : vector<8x128xf32> to vector<8x128xbf16>
    %c0_23 = arith.constant 0 : index
    %c0_24 = arith.constant 0 : index
    %43 = vector.load %arg4[%c0_23, %c0_24] : memref<128x512xbf16, #tpu.memory_space<vmem>>, vector<128x512xbf16>
    %cst_25 = arith.constant dense<0.000000e+00> : vector<8x512xf32>
    %44 = tpu.matmul %42, %43, %cst_25 {dimension_numbers = #tpu.dot_dimension_numbers<[1], [0], [0], [1], [0, 0, 1, 1], [], []>} : vector<8x128xbf16>, vector<128x512xbf16>, vector<8x512xf32> -> vector<8x512xf32>
    %45 = arith.addf %41, %44 : vector<8x512xf32>
    %46 = vector.extract_strided_slice %45 {offsets = [0, 0], sizes = [8, 384], strides = [1, 1]} : vector<8x512xf32> to vector<8x384xf32>
    %47 = arith.negf %46 : vector<8x384xf32>
    %48 = math.exp %47 : vector<8x384xf32>
    %cst_26 = arith.constant 1.000000e+00 : f32
    %49 = vector.broadcast %cst_26 : f32 to vector<8x384xf32>
    %50 = arith.addf %49, %48 : vector<8x384xf32>
    %51 = arith.divf %49, %50 : vector<8x384xf32>
    %52 = vector.extract_strided_slice %51 {offsets = [0, 0], sizes = [8, 128], strides = [1, 1]} : vector<8x384xf32> to vector<8x128xf32>
    %53 = vector.extract_strided_slice %51 {offsets = [0, 128], sizes = [8, 128], strides = [1, 1]} : vector<8x384xf32> to vector<8x128xf32>
    %54 = vector.extract_strided_slice %51 {offsets = [0, 256], sizes = [8, 128], strides = [1, 1]} : vector<8x384xf32> to vector<8x128xf32>
    %55 = vector.extract_strided_slice %45 {offsets = [0, 384], sizes = [8, 128], strides = [1, 1]} : vector<8x512xf32> to vector<8x128xf32>
    %56 = math.tanh %55 : vector<8x128xf32>
    %57 = arith.mulf %53, %32 : vector<8x128xf32>
    %58 = arith.mulf %52, %56 : vector<8x128xf32>
    %59 = arith.addf %57, %58 : vector<8x128xf32>
    %60 = math.tanh %59 : vector<8x128xf32>
    %61 = arith.mulf %54, %60 : vector<8x128xf32>
    %62 = arith.index_cast %c1_i32 : i32 to index
    %c0_27 = arith.constant 0 : index
    %c0_28 = arith.constant 0 : index
    %63 = vector.load %arg12[%62, %c0_27, %c0_28] : memref<8x8x128xf32, #tpu.memory_space<vmem>>, vector<1x8x128xf32>
    %64 = vector.shape_cast %63 : vector<1x8x128xf32> to vector<8x128xf32>
    %65 = vector.shape_cast %61 : vector<8x128xf32> to vector<1x8x128xf32>
    tpu.vector_store %arg12[%62, %c0_27, %c0_28], %65 {strides = array<i32>} : memref<8x8x128xf32, #tpu.memory_space<vmem>>, vector<1x8x128xf32>,
    %c2_i32 = arith.constant 2 : i32
    %66 = arith.index_cast %c2_i32 : i32 to index
    %c0_29 = arith.constant 0 : index
    %c0_30 = arith.constant 0 : index
    %67 = vector.load %arg11[%66, %c0_29, %c0_30] : memref<8x8x512xf32, #tpu.memory_space<vmem>>, vector<1x8x512xf32>
    %68 = vector.shape_cast %67 : vector<1x8x512xf32> to vector<8x512xf32>
    %69 = arith.truncf %61 : vector<8x128xf32> to vector<8x128xbf16>
    %c0_31 = arith.constant 0 : index
    %c0_32 = arith.constant 0 : index
    %70 = vector.load %arg4[%c0_31, %c0_32] : memref<128x512xbf16, #tpu.memory_space<vmem>>, vector<128x512xbf16>
    %cst_33 = arith.constant dense<0.000000e+00> : vector<8x512xf32>
    %71 = tpu.matmul %69, %70, %cst_33 {dimension_numbers = #tpu.dot_dimension_numbers<[1], [0], [0], [1], [0, 0, 1, 1], [], []>} : vector<8x128xbf16>, vector<128x512xbf16>, vector<8x512xf32> -> vector<8x512xf32>
    %72 = arith.addf %68, %71 : vector<8x512xf32>
    %73 = vector.extract_strided_slice %72 {offsets = [0, 0], sizes = [8, 384], strides = [1, 1]} : vector<8x512xf32> to vector<8x384xf32>
    %74 = arith.negf %73 : vector<8x384xf32>
    %75 = math.exp %74 : vector<8x384xf32>
    %cst_34 = arith.constant 1.000000e+00 : f32
    %76 = vector.broadcast %cst_34 : f32 to vector<8x384xf32>
    %77 = arith.addf %76, %75 : vector<8x384xf32>
    %78 = arith.divf %76, %77 : vector<8x384xf32>
    %79 = vector.extract_strided_slice %78 {offsets = [0, 0], sizes = [8, 128], strides = [1, 1]} : vector<8x384xf32> to vector<8x128xf32>
    %80 = vector.extract_strided_slice %78 {offsets = [0, 128], sizes = [8, 128], strides = [1, 1]} : vector<8x384xf32> to vector<8x128xf32>
    %81 = vector.extract_strided_slice %78 {offsets = [0, 256], sizes = [8, 128], strides = [1, 1]} : vector<8x384xf32> to vector<8x128xf32>
    %82 = vector.extract_strided_slice %72 {offsets = [0, 384], sizes = [8, 128], strides = [1, 1]} : vector<8x512xf32> to vector<8x128xf32>
    %83 = math.tanh %82 : vector<8x128xf32>
    %84 = arith.mulf %80, %59 : vector<8x128xf32>
    %85 = arith.mulf %79, %83 : vector<8x128xf32>
    %86 = arith.addf %84, %85 : vector<8x128xf32>
    %87 = math.tanh %86 : vector<8x128xf32>
    %88 = arith.mulf %81, %87 : vector<8x128xf32>
    %89 = arith.index_cast %c2_i32 : i32 to index
    %c0_35 = arith.constant 0 : index
    %c0_36 = arith.constant 0 : index
    %90 = vector.load %arg12[%89, %c0_35, %c0_36] : memref<8x8x128xf32, #tpu.memory_space<vmem>>, vector<1x8x128xf32>
    %91 = vector.shape_cast %90 : vector<1x8x128xf32> to vector<8x128xf32>
    %92 = vector.shape_cast %88 : vector<8x128xf32> to vector<1x8x128xf32>
    tpu.vector_store %arg12[%89, %c0_35, %c0_36], %92 {strides = array<i32>} : memref<8x8x128xf32, #tpu.memory_space<vmem>>, vector<1x8x128xf32>,
    %c3_i32 = arith.constant 3 : i32
    %93 = arith.index_cast %c3_i32 : i32 to index
    %c0_37 = arith.constant 0 : index
    %c0_38 = arith.constant 0 : index
    %94 = vector.load %arg11[%93, %c0_37, %c0_38] : memref<8x8x512xf32, #tpu.memory_space<vmem>>, vector<1x8x512xf32>
    %95 = vector.shape_cast %94 : vector<1x8x512xf32> to vector<8x512xf32>
    %96 = arith.truncf %88 : vector<8x128xf32> to vector<8x128xbf16>
    %c0_39 = arith.constant 0 : index
    %c0_40 = arith.constant 0 : index
    %97 = vector.load %arg4[%c0_39, %c0_40] : memref<128x512xbf16, #tpu.memory_space<vmem>>, vector<128x512xbf16>
    %cst_41 = arith.constant dense<0.000000e+00> : vector<8x512xf32>
    %98 = tpu.matmul %96, %97, %cst_41 {dimension_numbers = #tpu.dot_dimension_numbers<[1], [0], [0], [1], [0, 0, 1, 1], [], []>} : vector<8x128xbf16>, vector<128x512xbf16>, vector<8x512xf32> -> vector<8x512xf32>
    %99 = arith.addf %95, %98 : vector<8x512xf32>
    %100 = vector.extract_strided_slice %99 {offsets = [0, 0], sizes = [8, 384], strides = [1, 1]} : vector<8x512xf32> to vector<8x384xf32>
    %101 = arith.negf %100 : vector<8x384xf32>
    %102 = math.exp %101 : vector<8x384xf32>
    %cst_42 = arith.constant 1.000000e+00 : f32
    %103 = vector.broadcast %cst_42 : f32 to vector<8x384xf32>
    %104 = arith.addf %103, %102 : vector<8x384xf32>
    %105 = arith.divf %103, %104 : vector<8x384xf32>
    %106 = vector.extract_strided_slice %105 {offsets = [0, 0], sizes = [8, 128], strides = [1, 1]} : vector<8x384xf32> to vector<8x128xf32>
    %107 = vector.extract_strided_slice %105 {offsets = [0, 128], sizes = [8, 128], strides = [1, 1]} : vector<8x384xf32> to vector<8x128xf32>
    %108 = vector.extract_strided_slice %105 {offsets = [0, 256], sizes = [8, 128], strides = [1, 1]} : vector<8x384xf32> to vector<8x128xf32>
    %109 = vector.extract_strided_slice %99 {offsets = [0, 384], sizes = [8, 128], strides = [1, 1]} : vector<8x512xf32> to vector<8x128xf32>
    %110 = math.tanh %109 : vector<8x128xf32>
    %111 = arith.mulf %107, %86 : vector<8x128xf32>
    %112 = arith.mulf %106, %110 : vector<8x128xf32>
    %113 = arith.addf %111, %112 : vector<8x128xf32>
    %114 = math.tanh %113 : vector<8x128xf32>
    %115 = arith.mulf %108, %114 : vector<8x128xf32>
    %116 = arith.index_cast %c3_i32 : i32 to index
    %c0_43 = arith.constant 0 : index
    %c0_44 = arith.constant 0 : index
    %117 = vector.load %arg12[%116, %c0_43, %c0_44] : memref<8x8x128xf32, #tpu.memory_space<vmem>>, vector<1x8x128xf32>
    %118 = vector.shape_cast %117 : vector<1x8x128xf32> to vector<8x128xf32>
    %119 = vector.shape_cast %115 : vector<8x128xf32> to vector<1x8x128xf32>
    tpu.vector_store %arg12[%116, %c0_43, %c0_44], %119 {strides = array<i32>} : memref<8x8x128xf32, #tpu.memory_space<vmem>>, vector<1x8x128xf32>,
    %c4_i32 = arith.constant 4 : i32
    %120 = arith.index_cast %c4_i32 : i32 to index
    %c0_45 = arith.constant 0 : index
    %c0_46 = arith.constant 0 : index
    %121 = vector.load %arg11[%120, %c0_45, %c0_46] : memref<8x8x512xf32, #tpu.memory_space<vmem>>, vector<1x8x512xf32>
    %122 = vector.shape_cast %121 : vector<1x8x512xf32> to vector<8x512xf32>
    %123 = arith.truncf %115 : vector<8x128xf32> to vector<8x128xbf16>
    %c0_47 = arith.constant 0 : index
    %c0_48 = arith.constant 0 : index
    %124 = vector.load %arg4[%c0_47, %c0_48] : memref<128x512xbf16, #tpu.memory_space<vmem>>, vector<128x512xbf16>
    %cst_49 = arith.constant dense<0.000000e+00> : vector<8x512xf32>
    %125 = tpu.matmul %123, %124, %cst_49 {dimension_numbers = #tpu.dot_dimension_numbers<[1], [0], [0], [1], [0, 0, 1, 1], [], []>} : vector<8x128xbf16>, vector<128x512xbf16>, vector<8x512xf32> -> vector<8x512xf32>
    %126 = arith.addf %122, %125 : vector<8x512xf32>
    %127 = vector.extract_strided_slice %126 {offsets = [0, 0], sizes = [8, 384], strides = [1, 1]} : vector<8x512xf32> to vector<8x384xf32>
    %128 = arith.negf %127 : vector<8x384xf32>
    %129 = math.exp %128 : vector<8x384xf32>
    %cst_50 = arith.constant 1.000000e+00 : f32
    %130 = vector.broadcast %cst_50 : f32 to vector<8x384xf32>
    %131 = arith.addf %130, %129 : vector<8x384xf32>
    %132 = arith.divf %130, %131 : vector<8x384xf32>
    %133 = vector.extract_strided_slice %132 {offsets = [0, 0], sizes = [8, 128], strides = [1, 1]} : vector<8x384xf32> to vector<8x128xf32>
    %134 = vector.extract_strided_slice %132 {offsets = [0, 128], sizes = [8, 128], strides = [1, 1]} : vector<8x384xf32> to vector<8x128xf32>
    %135 = vector.extract_strided_slice %132 {offsets = [0, 256], sizes = [8, 128], strides = [1, 1]} : vector<8x384xf32> to vector<8x128xf32>
    %136 = vector.extract_strided_slice %126 {offsets = [0, 384], sizes = [8, 128], strides = [1, 1]} : vector<8x512xf32> to vector<8x128xf32>
    %137 = math.tanh %136 : vector<8x128xf32>
    %138 = arith.mulf %134, %113 : vector<8x128xf32>
    %139 = arith.mulf %133, %137 : vector<8x128xf32>
    %140 = arith.addf %138, %139 : vector<8x128xf32>
    %141 = math.tanh %140 : vector<8x128xf32>
    %142 = arith.mulf %135, %141 : vector<8x128xf32>
    %143 = arith.index_cast %c4_i32 : i32 to index
    %c0_51 = arith.constant 0 : index
    %c0_52 = arith.constant 0 : index
    %144 = vector.load %arg12[%143, %c0_51, %c0_52] : memref<8x8x128xf32, #tpu.memory_space<vmem>>, vector<1x8x128xf32>
    %145 = vector.shape_cast %144 : vector<1x8x128xf32> to vector<8x128xf32>
    %146 = vector.shape_cast %142 : vector<8x128xf32> to vector<1x8x128xf32>
    tpu.vector_store %arg12[%143, %c0_51, %c0_52], %146 {strides = array<i32>} : memref<8x8x128xf32, #tpu.memory_space<vmem>>, vector<1x8x128xf32>,
    %c5_i32 = arith.constant 5 : i32
    %147 = arith.index_cast %c5_i32 : i32 to index
    %c0_53 = arith.constant 0 : index
    %c0_54 = arith.constant 0 : index
    %148 = vector.load %arg11[%147, %c0_53, %c0_54] : memref<8x8x512xf32, #tpu.memory_space<vmem>>, vector<1x8x512xf32>
    %149 = vector.shape_cast %148 : vector<1x8x512xf32> to vector<8x512xf32>
    %150 = arith.truncf %142 : vector<8x128xf32> to vector<8x128xbf16>
    %c0_55 = arith.constant 0 : index
    %c0_56 = arith.constant 0 : index
    %151 = vector.load %arg4[%c0_55, %c0_56] : memref<128x512xbf16, #tpu.memory_space<vmem>>, vector<128x512xbf16>
    %cst_57 = arith.constant dense<0.000000e+00> : vector<8x512xf32>
    %152 = tpu.matmul %150, %151, %cst_57 {dimension_numbers = #tpu.dot_dimension_numbers<[1], [0], [0], [1], [0, 0, 1, 1], [], []>} : vector<8x128xbf16>, vector<128x512xbf16>, vector<8x512xf32> -> vector<8x512xf32>
    %153 = arith.addf %149, %152 : vector<8x512xf32>
    %154 = vector.extract_strided_slice %153 {offsets = [0, 0], sizes = [8, 384], strides = [1, 1]} : vector<8x512xf32> to vector<8x384xf32>
    %155 = arith.negf %154 : vector<8x384xf32>
    %156 = math.exp %155 : vector<8x384xf32>
    %cst_58 = arith.constant 1.000000e+00 : f32
    %157 = vector.broadcast %cst_58 : f32 to vector<8x384xf32>
    %158 = arith.addf %157, %156 : vector<8x384xf32>
    %159 = arith.divf %157, %158 : vector<8x384xf32>
    %160 = vector.extract_strided_slice %159 {offsets = [0, 0], sizes = [8, 128], strides = [1, 1]} : vector<8x384xf32> to vector<8x128xf32>
    %161 = vector.extract_strided_slice %159 {offsets = [0, 128], sizes = [8, 128], strides = [1, 1]} : vector<8x384xf32> to vector<8x128xf32>
    %162 = vector.extract_strided_slice %159 {offsets = [0, 256], sizes = [8, 128], strides = [1, 1]} : vector<8x384xf32> to vector<8x128xf32>
    %163 = vector.extract_strided_slice %153 {offsets = [0, 384], sizes = [8, 128], strides = [1, 1]} : vector<8x512xf32> to vector<8x128xf32>
    %164 = math.tanh %163 : vector<8x128xf32>
    %165 = arith.mulf %161, %140 : vector<8x128xf32>
    %166 = arith.mulf %160, %164 : vector<8x128xf32>
    %167 = arith.addf %165, %166 : vector<8x128xf32>
    %168 = math.tanh %167 : vector<8x128xf32>
    %169 = arith.mulf %162, %168 : vector<8x128xf32>
    %170 = arith.index_cast %c5_i32 : i32 to index
    %c0_59 = arith.constant 0 : index
    %c0_60 = arith.constant 0 : index
    %171 = vector.load %arg12[%170, %c0_59, %c0_60] : memref<8x8x128xf32, #tpu.memory_space<vmem>>, vector<1x8x128xf32>
    %172 = vector.shape_cast %171 : vector<1x8x128xf32> to vector<8x128xf32>
    %173 = vector.shape_cast %169 : vector<8x128xf32> to vector<1x8x128xf32>
    tpu.vector_store %arg12[%170, %c0_59, %c0_60], %173 {strides = array<i32>} : memref<8x8x128xf32, #tpu.memory_space<vmem>>, vector<1x8x128xf32>,
    %c6_i32 = arith.constant 6 : i32
    %174 = arith.index_cast %c6_i32 : i32 to index
    %c0_61 = arith.constant 0 : index
    %c0_62 = arith.constant 0 : index
    %175 = vector.load %arg11[%174, %c0_61, %c0_62] : memref<8x8x512xf32, #tpu.memory_space<vmem>>, vector<1x8x512xf32>
    %176 = vector.shape_cast %175 : vector<1x8x512xf32> to vector<8x512xf32>
    %177 = arith.truncf %169 : vector<8x128xf32> to vector<8x128xbf16>
    %c0_63 = arith.constant 0 : index
    %c0_64 = arith.constant 0 : index
    %178 = vector.load %arg4[%c0_63, %c0_64] : memref<128x512xbf16, #tpu.memory_space<vmem>>, vector<128x512xbf16>
    %cst_65 = arith.constant dense<0.000000e+00> : vector<8x512xf32>
    %179 = tpu.matmul %177, %178, %cst_65 {dimension_numbers = #tpu.dot_dimension_numbers<[1], [0], [0], [1], [0, 0, 1, 1], [], []>} : vector<8x128xbf16>, vector<128x512xbf16>, vector<8x512xf32> -> vector<8x512xf32>
    %180 = arith.addf %176, %179 : vector<8x512xf32>
    %181 = vector.extract_strided_slice %180 {offsets = [0, 0], sizes = [8, 384], strides = [1, 1]} : vector<8x512xf32> to vector<8x384xf32>
    %182 = arith.negf %181 : vector<8x384xf32>
    %183 = math.exp %182 : vector<8x384xf32>
    %cst_66 = arith.constant 1.000000e+00 : f32
    %184 = vector.broadcast %cst_66 : f32 to vector<8x384xf32>
    %185 = arith.addf %184, %183 : vector<8x384xf32>
    %186 = arith.divf %184, %185 : vector<8x384xf32>
    %187 = vector.extract_strided_slice %186 {offsets = [0, 0], sizes = [8, 128], strides = [1, 1]} : vector<8x384xf32> to vector<8x128xf32>
    %188 = vector.extract_strided_slice %186 {offsets = [0, 128], sizes = [8, 128], strides = [1, 1]} : vector<8x384xf32> to vector<8x128xf32>
    %189 = vector.extract_strided_slice %186 {offsets = [0, 256], sizes = [8, 128], strides = [1, 1]} : vector<8x384xf32> to vector<8x128xf32>
    %190 = vector.extract_strided_slice %180 {offsets = [0, 384], sizes = [8, 128], strides = [1, 1]} : vector<8x512xf32> to vector<8x128xf32>
    %191 = math.tanh %190 : vector<8x128xf32>
    %192 = arith.mulf %188, %167 : vector<8x128xf32>
    %193 = arith.mulf %187, %191 : vector<8x128xf32>
    %194 = arith.addf %192, %193 : vector<8x128xf32>
    %195 = math.tanh %194 : vector<8x128xf32>
    %196 = arith.mulf %189, %195 : vector<8x128xf32>
    %197 = arith.index_cast %c6_i32 : i32 to index
    %c0_67 = arith.constant 0 : index
    %c0_68 = arith.constant 0 : index
    %198 = vector.load %arg12[%197, %c0_67, %c0_68] : memref<8x8x128xf32, #tpu.memory_space<vmem>>, vector<1x8x128xf32>
    %199 = vector.shape_cast %198 : vector<1x8x128xf32> to vector<8x128xf32>
    %200 = vector.shape_cast %196 : vector<8x128xf32> to vector<1x8x128xf32>
    tpu.vector_store %arg12[%197, %c0_67, %c0_68], %200 {strides = array<i32>} : memref<8x8x128xf32, #tpu.memory_space<vmem>>, vector<1x8x128xf32>,
    %c7_i32 = arith.constant 7 : i32
    %201 = arith.index_cast %c7_i32 : i32 to index
    %c0_69 = arith.constant 0 : index
    %c0_70 = arith.constant 0 : index
    %202 = vector.load %arg11[%201, %c0_69, %c0_70] : memref<8x8x512xf32, #tpu.memory_space<vmem>>, vector<1x8x512xf32>
    %203 = vector.shape_cast %202 : vector<1x8x512xf32> to vector<8x512xf32>
    %204 = arith.truncf %196 : vector<8x128xf32> to vector<8x128xbf16>
    %c0_71 = arith.constant 0 : index
    %c0_72 = arith.constant 0 : index
    %205 = vector.load %arg4[%c0_71, %c0_72] : memref<128x512xbf16, #tpu.memory_space<vmem>>, vector<128x512xbf16>
    %cst_73 = arith.constant dense<0.000000e+00> : vector<8x512xf32>
    %206 = tpu.matmul %204, %205, %cst_73 {dimension_numbers = #tpu.dot_dimension_numbers<[1], [0], [0], [1], [0, 0, 1, 1], [], []>} : vector<8x128xbf16>, vector<128x512xbf16>, vector<8x512xf32> -> vector<8x512xf32>
    %207 = arith.addf %203, %206 : vector<8x512xf32>
    %208 = vector.extract_strided_slice %207 {offsets = [0, 0], sizes = [8, 384], strides = [1, 1]} : vector<8x512xf32> to vector<8x384xf32>
    %209 = arith.negf %208 : vector<8x384xf32>
    %210 = math.exp %209 : vector<8x384xf32>
    %cst_74 = arith.constant 1.000000e+00 : f32
    %211 = vector.broadcast %cst_74 : f32 to vector<8x384xf32>
    %212 = arith.addf %211, %210 : vector<8x384xf32>
    %213 = arith.divf %211, %212 : vector<8x384xf32>
    %214 = vector.extract_strided_slice %213 {offsets = [0, 0], sizes = [8, 128], strides = [1, 1]} : vector<8x384xf32> to vector<8x128xf32>
    %215 = vector.extract_strided_slice %213 {offsets = [0, 128], sizes = [8, 128], strides = [1, 1]} : vector<8x384xf32> to vector<8x128xf32>
    %216 = vector.extract_strided_slice %213 {offsets = [0, 256], sizes = [8, 128], strides = [1, 1]} : vector<8x384xf32> to vector<8x128xf32>
    %217 = vector.extract_strided_slice %207 {offsets = [0, 384], sizes = [8, 128], strides = [1, 1]} : vector<8x512xf32> to vector<8x128xf32>
    %218 = math.tanh %217 : vector<8x128xf32>
    %219 = arith.mulf %215, %194 : vector<8x128xf32>
    %220 = arith.mulf %214, %218 : vector<8x128xf32>
    %221 = arith.addf %219, %220 : vector<8x128xf32>
    %222 = math.tanh %221 : vector<8x128xf32>
    %223 = arith.mulf %216, %222 : vector<8x128xf32>
    %224 = arith.index_cast %c7_i32 : i32 to index
    %c0_75 = arith.constant 0 : index
    %c0_76 = arith.constant 0 : index
    %225 = vector.load %arg12[%224, %c0_75, %c0_76] : memref<8x8x128xf32, #tpu.memory_space<vmem>>, vector<1x8x128xf32>
    %226 = vector.shape_cast %225 : vector<1x8x128xf32> to vector<8x128xf32>
    %227 = vector.shape_cast %223 : vector<8x128xf32> to vector<1x8x128xf32>
    tpu.vector_store %arg12[%224, %c0_75, %c0_76], %227 {strides = array<i32>} : memref<8x8x128xf32, #tpu.memory_space<vmem>>, vector<1x8x128xf32>,
    %c8_i32 = arith.constant 8 : i32
    %c0_77 = arith.constant 0 : index
    %c0_78 = arith.constant 0 : index
    %228 = vector.load %arg9[%c0_77, %c0_78] : memref<8x128xf32, #tpu.memory_space<vmem>>, vector<8x128xf32>
    tpu.vector_store %arg9[%c0_77, %c0_78], %223 {strides = array<i32>} : memref<8x128xf32, #tpu.memory_space<vmem>>, vector<8x128xf32>,
    %c0_79 = arith.constant 0 : index
    %c0_80 = arith.constant 0 : index
    %229 = vector.load %arg10[%c0_79, %c0_80] : memref<8x128xf32, #tpu.memory_space<vmem>>, vector<8x128xf32>
    tpu.vector_store %arg10[%c0_79, %c0_80], %221 {strides = array<i32>} : memref<8x128xf32, #tpu.memory_space<vmem>>, vector<8x128xf32>,
    %c0_81 = arith.constant 0 : index
    %c0_82 = arith.constant 0 : index
    %c0_83 = arith.constant 0 : index
    %230 = vector.load %arg12[%c0_81, %c0_82, %c0_83] : memref<8x8x128xf32, #tpu.memory_space<vmem>>, vector<8x8x128xf32>
    %231 = vector.shape_cast %230 : vector<8x8x128xf32> to vector<64x128xf32>
    %232 = arith.truncf %231 : vector<64x128xf32> to vector<64x128xbf16>
    %c0_84 = arith.constant 0 : index
    %c0_85 = arith.constant 0 : index
    %233 = vector.load %arg6[%c0_84, %c0_85] : memref<128x128xbf16, #tpu.memory_space<vmem>>, vector<128x128xbf16>
    %cst_86 = arith.constant dense<0.000000e+00> : vector<64x128xf32>
    %234 = tpu.matmul %232, %233, %cst_86 {dimension_numbers = #tpu.dot_dimension_numbers<[1], [0], [0], [1], [0, 0, 1, 1], [], []>} : vector<64x128xbf16>, vector<128x128xbf16>, vector<64x128xf32> -> vector<64x128xf32>
    %c0_87 = arith.constant 0 : index
    %c0_88 = arith.constant 0 : index
    %235 = vector.load %arg7[%c0_87, %c0_88] : memref<1x128xf32, #tpu.memory_space<vmem>>, vector<1x128xf32>
    %236 = vector.broadcast %235 : vector<1x128xf32> to vector<64x128xf32>
    %237 = arith.addf %234, %236 : vector<64x128xf32>
    %238 = vector.shape_cast %237 : vector<64x128xf32> to vector<8x8x128xf32>
    %c0_89 = arith.constant 0 : index
    %c0_90 = arith.constant 0 : index
    %c0_91 = arith.constant 0 : index
    %239 = vector.load %arg8[%c0_89, %c0_90, %c0_91] : memref<8x8x128xf32, #tpu.memory_space<vmem>>, vector<8x8x128xf32>
    tpu.vector_store %arg8[%c0_89, %c0_90, %c0_91], %238 {strides = array<i32>} : memref<8x8x128xf32, #tpu.memory_space<vmem>>, vector<8x8x128xf32>,
    return
  }
}

</mosaic_0001>

<bundles_post_ra>
// kernel: tpu_custom_call.1
= control target key start
LH: loop header
LB: loop body
LE: loop exit
PB: predicated region body
PF: predicated region fallthrough
CT: control target
= control target key end

     0   :  { %16 = vsyncpa [#allocation5], 0  ;;  %s4654_s0 = inlined_call_operand.hbm [shape: f32[8,8,16], index: 0, kind: input, shape index: {}]   ;;  %s4655_s1 = inlined_call_operand.hbm [shape: f32[8,128], index: 1, kind: input, shape index: {}]   ;;  %s4656_s2 = inlined_call_operand.hbm [shape: f32[8,128], index: 2, kind: input, shape index: {}]   ;;  %s4657_s3 = inlined_call_operand.hbm [shape: bf16[16,512], index: 3, kind: input, shape index: {}]   ;;  %s4658_s4 = inlined_call_operand.hbm [shape: bf16[128,512], index: 4, kind: input, shape index: {}]   ;;  %s4659_s5 = inlined_call_operand.vmem [shape: f32[1,512], index: 5, kind: input, shape index: {}]   ;;  %s4660_s6 = inlined_call_operand.hbm [shape: bf16[128,128], index: 6, kind: input, shape index: {}]   ;;  %s4661_s7 = inlined_call_operand.vmem [shape: f32[1,128], index: 7, kind: input, shape index: {}]   ;;  %s4662_s8 = inlined_call_operand.hbm [shape: f32[8,8,128], index: 8, kind: output, shape index: {0}]   ;;  %s4663_s9 = inlined_call_operand.hbm [shape: f32[8,128], index: 9, kind: output, shape index: {1}]   ;;  %s4664_s10 = inlined_call_operand.hbm [shape: f32[8,128], index: 10, kind: output, shape index: {2}]  }
   0x1   :  { %17 = vsyncpa [#allocation8], 0 }
   0x2   :  { %18 = vsyncpa [#allocation11], 0 }
   0x3   :  { %19 = vsyncpa [#allocation14], 0 }
   0x4   :  { %20 = vsyncpa [#allocation6], 0 }
   0x5   :  { %21 = vsyncpa [#allocation17], 0  ;;  %s3857_s13 = smov [#allocation7]   ;;  %s3858_s15 = smov [#allocation10]  }
   0x6   :  { %s40_s14 = sshll.u32 %s3857_s13, 4  ;;  %s59_s16 = sshll.u32 %s3858_s15, 4  ;;  %s41_s14 = int_to_ptr.vmem [resolvable:$true] %s40_s14  ;;  %s3928_s16 = int_to_ptr.vmem [resolvable:$true] %s59_s16 }
   0x7   :  { %s3647_s19 = scalar_lea.hbm %s4655_s1, 128 }
   0x8   :  { %p3648_p0 = scmp.ne.s32.totalorder %s4655_s1, %s3647_s19  ;;  %p3651_p1 = scmp.lt.u32.totalorder %s3647_s19, %s4655_s1 }
   0xa   :  { %p3653_p2 = pnand %p3651_p1, %p3648_p0 }
   0xc   :  { %3656 = shalt.err (!%p3653_p2)
}
   0xd   :  { %s3657_s24 = scalar_lea.vmem %s41_s14, 128  ;;  %p3662_p4 = scmp.lt.s32.totalorder %s41_s14, %s41_s14 }
   0xe   :  { %p3658_p3 = scmp.ne.s32.totalorder %s41_s14, %s3657_s24  ;;  %p3663_p5 = scmp.lt.s32.totalorder %s3657_s24, %s3657_s24 }
  0x10   :  { %p3664_p6 = por %p3663_p5, %p3662_p4 }
  0x12   :  { %p3665_p7 = pnand %p3664_p6, %p3658_p3 }
  0x14   :  { %3668 = shalt.err (!%p3665_p7)
}
  0x15   :  { %43 = dma.hbm_to_vmem [thread:$0]  %s4655_s1, 128, %s41_s14, [#allocation8]  }
  0x16   :  { %s3669_s29 = scalar_lea.hbm %s4657_s3, 512 }
  0x17   :  { %p3670_p8 = scmp.ne.s32.totalorder %s4657_s3, %s3669_s29  ;;  %p3673_p9 = scmp.lt.u32.totalorder %s3669_s29, %s4657_s3 }
  0x19   :  { %p3675_p10 = pnand %p3673_p9, %p3670_p8 }
  0x1b   :  { %3678 = shalt.err (!%p3675_p10)
}
  0x1c   :  { %s3679_s15 = scalar_lea.vmem %s3928_s16, 512  ;;  %p3684_p12 = scmp.lt.s32.totalorder %s3928_s16, %s3928_s16 }
  0x1d   :  { %p3680_p11 = scmp.ne.s32.totalorder %s3928_s16, %s3679_s15  ;;  %p3685_p13 = scmp.lt.s32.totalorder %s3679_s15, %s3679_s15 }
  0x1f   :  { %p3686_p0 = por %p3685_p13, %p3684_p12 }
  0x21   :  { %p3687_p1 = pnand %p3686_p0, %p3680_p11 }
  0x23   :  { %3690 = shalt.err (!%p3687_p1)
}
  0x24   :  { %s3859_s1 = smov 256   ;;  %s3860_s14 = smov 16  }
  0x25   :  { %65 = dma.hbm_to_vmem [thread:$0]  %s4657_s3, 512, %s3928_s16, [#allocation11], %s3859_s1, %s3859_s1, %s3860_s14  }
  0x26   :  { %s3861_s19 = smov [#allocation4]   ;;  %s3691_s23 = scalar_lea.hbm %s4654_s0, 1024 }
  0x27   :  { %s27_s20 = sshll.u32 %s3861_s19, 4  ;;  %p3692_p2 = scmp.ne.s32.totalorder %s4654_s0, %s3691_s23  ;;  %s28_s20 = int_to_ptr.vmem [resolvable:$true] %s27_s20 }
  0x28   :  { %p3695_p3 = scmp.lt.u32.totalorder %s3691_s23, %s4654_s0 }
  0x2a   :  { %p3697_p4 = pnand %p3695_p3, %p3692_p2 }
  0x2c   :  { %3700 = shalt.err (!%p3697_p4)
}
  0x2d   :  { %s3701_s28 = scalar_lea.vmem %s28_s20, 1024  ;;  %p3706_p6 = scmp.lt.s32.totalorder %s28_s20, %s28_s20 }
  0x2e   :  { %p3702_p5 = scmp.ne.s32.totalorder %s28_s20, %s3701_s28  ;;  %p3707_p7 = scmp.lt.s32.totalorder %s3701_s28, %s3701_s28 }
  0x30   :  { %p3708_p8 = por %p3707_p7, %p3706_p6 }
  0x32   :  { %p3709_p9 = pnand %p3708_p8, %p3702_p5 }
  0x34   :  { %3712 = shalt.err (!%p3709_p9)
}
  0x35   :  { %s3862_s3 = smov 128   ;;  %s3863_s16 = smov 8  }
  0x36   :  { %33 = dma.hbm_to_vmem [thread:$0]  %s4654_s0, 1024, %s28_s20, [#allocation5], %s3862_s3, %s3862_s3, %s3863_s16  }
  0x37   :  { %s3864_s11 = smov [#allocation9]   ;;  %s3865_s13 = smov [#allocation12]  }
  0x38   :  { %s50_s12 = sshll.u32 %s3864_s11, 4  ;;  %s71_s15 = sshll.u32 %s3865_s13, 4  ;;  %s51_s12 = int_to_ptr.vmem [resolvable:$true] %s50_s12  ;;  %s72_s15 = int_to_ptr.vmem [resolvable:$true] %s71_s15 }
  0x39   :  { %s3713_s19 = scalar_lea.hbm %s4656_s2, 128 }
  0x3a   :  { %p3714_p10 = scmp.ne.s32.totalorder %s4656_s2, %s3713_s19  ;;  %p3717_p11 = scmp.lt.u32.totalorder %s3713_s19, %s4656_s2 }
  0x3c   :  { %p3719_p12 = pnand %p3717_p11, %p3714_p10 }
  0x3e   :  { %3722 = shalt.err (!%p3719_p12)
}
  0x3f   :  { %s3723_s0 = scalar_lea.vmem %s51_s12, 128  ;;  %p3728_p0 = scmp.lt.s32.totalorder %s51_s12, %s51_s12 }
  0x40   :  { %p3724_p13 = scmp.ne.s32.totalorder %s51_s12, %s3723_s0  ;;  %p3729_p1 = scmp.lt.s32.totalorder %s3723_s0, %s3723_s0 }
  0x42   :  { %p3730_p2 = por %p3729_p1, %p3728_p0 }
  0x44   :  { %p3731_p3 = pnand %p3730_p2, %p3724_p13 }
  0x46   :  { %3734 = shalt.err (!%p3731_p3)
}
  0x47   :  { %53 = dma.hbm_to_vmem [thread:$0]  %s4656_s2, 128, %s51_s12, [#allocation8]  }
  0x48   :  { %s3735_s28 = scalar_lea.hbm %s4658_s4, 4096 }
  0x49   :  { %p3736_p4 = scmp.ne.s32.totalorder %s4658_s4, %s3735_s28  ;;  %p3739_p5 = scmp.lt.u32.totalorder %s3735_s28, %s4658_s4 }
  0x4b   :  { %p3741_p6 = pnand %p3739_p5, %p3736_p4 }
  0x4d   :  { %3744 = shalt.err (!%p3741_p6)
}
  0x4e   :  { %s3745_s17 = scalar_lea.vmem %s72_s15, 4096  ;;  %p3750_p8 = scmp.lt.s32.totalorder %s72_s15, %s72_s15 }
  0x4f   :  { %p3746_p7 = scmp.ne.s32.totalorder %s72_s15, %s3745_s17  ;;  %p3751_p9 = scmp.lt.s32.totalorder %s3745_s17, %s3745_s17 }
  0x51   :  { %p3752_p10 = por %p3751_p9, %p3750_p8 }
  0x53   :  { %p3753_p11 = pnand %p3752_p10, %p3746_p7 }
  0x55   :  { %3756 = shalt.err (!%p3753_p11)
}
  0x56   :  { %77 = dma.hbm_to_vmem [thread:$0]  %s4658_s4, 4096, %s72_s15, [#allocation11], %s3859_s1, %s3859_s1, %s3860_s14  }
  0x57   :  { %s3866_s18 = smov [#allocation13]   ;;  %s3757_s23 = scalar_lea.hbm %s4660_s6, 1024 }
  0x58   :  { %s85_s19 = sshll.u32 %s3866_s18, 4  ;;  %p3758_p12 = scmp.ne.s32.totalorder %s4660_s6, %s3757_s23  ;;  %s86_s19 = int_to_ptr.vmem [resolvable:$true] %s85_s19 }
  0x59   :  { %p3761_p13 = scmp.lt.u32.totalorder %s3757_s23, %s4660_s6 }
  0x5b   :  { %p3763_p0 = pnand %p3761_p13, %p3758_p12 }
  0x5d   :  { %3766 = shalt.err (!%p3763_p0)
}
  0x5e   :  { %s3767_s26 = scalar_lea.vmem %s86_s19, 1024  ;;  %p3772_p2 = scmp.lt.s32.totalorder %s86_s19, %s86_s19 }
  0x5f   :  { %p3768_p1 = scmp.ne.s32.totalorder %s86_s19, %s3767_s26  ;;  %p3773_p3 = scmp.lt.s32.totalorder %s3767_s26, %s3767_s26 }
  0x61   :  { %p3774_p4 = por %p3773_p3, %p3772_p2 }
  0x63   :  { %p3775_p5 = pnand %p3774_p4, %p3768_p1 }
  0x65   :  { %3778 = shalt.err (!%p3775_p5)
}
  0x66   :  { %s3867_s4 = smov 64   ;;  %s3868_s1 = smov 4  }
  0x67   :  { %91 = dma.hbm_to_vmem [thread:$0]  %s4660_s6, 1024, %s86_s19, [#allocation14], %s3867_s4, %s3867_s4, %s3868_s1  }
  0x68   :  { %3845 = dma.done.wait [#allocation5], 1024  }
  0x69   :  { %3846 = vsyncadd [#allocation5], 4294966272 }
  0x6a   :  { %3847 = dma.done.wait [#allocation8], 256  }
  0x6b   :  { %3848 = vsyncadd [#allocation8], 4294967040 }
  0x6c   :  { %3849 = dma.done.wait [#allocation11], 4608  }
  0x6d   :  { %3850 = vsyncadd [#allocation11], 4294962688 }
  0x6e   :  { %3851 = dma.done.wait [#allocation14], 1024  }
  0x6f   :  { %3852 = vsyncadd [#allocation14], 4294966272  ;;  %v4665_v0 = vmov 0   ;;  %v3400_v1 = vld [vmem:[#allocation10 + $0xc] ss:$16 sps:$4 sm:$0xff]   ;;  %v113_v3 = vld [vmem:[#allocation4] sm:$0xff]  ;;  %v131_v51 = vlaneseq }
  0x70   :  { %289 = vmatprep.mubr.bf16.mxu1 %v4665_v0  ;;  %216 = vmatprep.mubr.bf16.mxu0 %v4665_v0  ;;  %v3402_v2 = vld [vmem:[#allocation10 + $0x8] ss:$16 sps:$4 sm:$0xff]   ;;  %v4018_v6 = vld [vmem:[#allocation12] ss:$16 sps:$4 sm:$0xff]   ;;  %vm171_vm0 = vcmask 130048  }
  0x71   :  { %v114_v4 = vld [vmem:[#allocation4 + $0x8] sm:$0xff]  ;;  %257 = vmatprep.subr.bf16.mxu1 %v3400_v1  ;;  %v4020_v7 = vld [vmem:[#allocation12 + $0x4] ss:$16 sps:$4 sm:$0xff]   ;;  %v4026_v9 = vld [vmem:[#allocation12 + $0x20] ss:$16 sps:$4 sm:$0xff]   ;;  %v132_v52 = vshrl.u32 %v131_v51, 7 }
  0x72   :  { %v121_v5 = vpack.c.bf16 %v114_v4, %v113_v3  ;;  %258 = vmatpush1.bf16.msra.mxu1 %v3402_v2  ;;  %v4022_v8 = vld [vmem:[#allocation12 + $0x24] ss:$16 sps:$4 sm:$0xff]   ;;  %v116_v11 = vld [vmem:[#allocation4 + $0x18] sm:$0xff]  ;;  %v4034_v14 = vld [vmem:[#allocation12 + $0x40] ss:$16 sps:$4 sm:$0xff]  }
  0x73   :  { %561 = vmatprep.subr.bf16.mxu1 %v4020_v7  ;;  %v115_v10 = vld [vmem:[#allocation4 + $0x10] sm:$0xff]  ;;  %v117_v19 = vld [vmem:[#allocation4 + $0x20] sm:$0xff]  ;;  %v118_v20 = vld [vmem:[#allocation4 + $0x28] sm:$0xff]  ;;  %v141_v53 = vsub.s32 2, %v132_v52  ;;  %v145_v55 = vsub.s32 3, %v132_v52 }
  0x74   :  { %v4031_v12 = vld [vmem:[#allocation12 + $0x44] ss:$16 sps:$4 sm:$0xff]   ;;  %v122_v13 = vpack.c.bf16 %v116_v11, %v115_v10  ;;  %v4039_v16 = vld [vmem:[#allocation12 + $0x60] ss:$16 sps:$4 sm:$0xff]   ;;  %v123_v22 = vpack.c.bf16 %v118_v20, %v117_v19  ;;  %v120_v27 = vld [vmem:[#allocation4 + $0x38] sm:$0xff] }
  0x75   :  { %3055 = vmatmul.mubr.msk.bf16.vlgmr.msra.gmra.mrb[0].mxu1 %vm171_vm0, %v121_v5  ;;  %v4037_v15 = vld [vmem:[#allocation12 + $0x64] ss:$16 sps:$4 sm:$0xff]   ;;  %v3426_v18 = vld [vmem:[#allocation10] ss:$16 sps:$4 sm:$0xff]   ;;  %v4080_v34 = vld [vmem:[#allocation12 + $0xc] ss:$16 sps:$4 sm:$0xff]  }
  0x76   :  { %562 = vmatpush1.bf16.msra.mxu1 %v4018_v6  ;;  %299 = vmatprep.mubr.bf16.mxu1 %v4665_v0  ;;  %v3424_v17 = vld [vmem:[#allocation10 + $0x4] ss:$16 sps:$4 sm:$0xff]   ;;  %v4049_v23 = vld [vmem:[#allocation12 + $0x80] ss:$16 sps:$4 sm:$0xff]   ;;  %v4086_v35 = vld [vmem:[#allocation12 + $0x8] ss:$16 sps:$4 sm:$0xff]  }
  0x77   :  { %563 = vmatprep.subr.bf16.mxu1 %v4022_v8  ;;  %v4045_v21 = vld [vmem:[#allocation12 + $0x84] ss:$16 sps:$4 sm:$0xff]   ;;  %184 = vmatprep.subr.bf16.mxu0 %v3424_v17  ;;  %v4058_v25 = vld [vmem:[#allocation12 + $0xa0] ss:$16 sps:$4 sm:$0xff]   ;;  %v4089_v37 = vld [vmem:[#allocation12 + $0x2c] ss:$16 sps:$4 sm:$0xff]  }
  0x78   :  { %185 = vmatpush1.bf16.msra.mxu0 %v3426_v18  ;;  %v4052_v24 = vld [vmem:[#allocation12 + $0xa4] ss:$16 sps:$4 sm:$0xff]   ;;  %v4067_v30 = vld [vmem:[#allocation12 + $0xc0] ss:$16 sps:$4 sm:$0xff]   ;;  %v4095_v38 = vld [vmem:[#allocation12 + $0x28] ss:$16 sps:$4 sm:$0xff]  }
  0x79   :  { %870 = vmatprep.subr.bf16.mxu0 %v4020_v7  ;;  %v119_v26 = vld [vmem:[#allocation4 + $0x30] sm:$0xff]  ;;  %v362_v33 = vld [vmem:[#allocation7] sm:$0xff]  ;;  %v4099_v39 = vld [vmem:[#allocation12 + $0x4c] ss:$16 sps:$4 sm:$0xff]   ;;  %v137_v18 = vsub.s32 1, %v132_v52 }
  0x7a   :  { %564 = vmatpush1.bf16.msra.mxu1 %v4026_v9  ;;  %v4064_v28 = vld [vmem:[#allocation12 + $0xc4] ss:$16 sps:$4 sm:$0xff]   ;;  %v124_v29 = vpack.c.bf16 %v120_v27, %v119_v26  ;;  %v4075_v32 = vld [vmem:[#allocation12 + $0xe0] ss:$16 sps:$4 sm:$0xff]   ;;  %v368_v36 = vpack.c.bf16 %v362_v33, %v362_v33  ;;  %v4105_v40 = vld [vmem:[#allocation12 + $0x48] ss:$16 sps:$4 sm:$0xff]  }
  0x7b   :  { %565 = vmatprep.subr.bf16.mxu1 %v4031_v12  ;;  %3051 = vmatmul.mubr.msk.bf16.vlgmr.msra.gmra.mrb[0].mxu0 %vm171_vm0, %v121_v5  ;;  %v4071_v31 = vld [vmem:[#allocation12 + $0xe4] ss:$16 sps:$4 sm:$0xff]   ;;  %v4108_v41 = vld [vmem:[#allocation12 + $0x6c] ss:$16 sps:$4 sm:$0xff]   ;;  %v4118_v42 = vld [vmem:[#allocation12 + $0x68] ss:$16 sps:$4 sm:$0xff]  }
  0x7c   :  { %871 = vmatpush1.bf16.msra.mxu0 %v4018_v6  ;;  %226 = vmatprep.mubr.bf16.mxu0 %v4665_v0  ;;  %v4121_v43 = vld [vmem:[#allocation12 + $0x8c] ss:$16 sps:$4 sm:$0xff]   ;;  %v4126_v44 = vld [vmem:[#allocation12 + $0x88] ss:$16 sps:$4 sm:$0xff]   ;;  %v129_v54 = vld [vmem:[%s4659_s5] sm:$0xf] }
  0x7d   :  { %3056 = vmatmul.mubr.msk.bf16.gmra.mrb[4].mxu1 %vm171_vm0, %v122_v13  ;;  %872 = vmatprep.subr.bf16.mxu0 %v4022_v8  ;;  %v4129_v45 = vld [vmem:[#allocation12 + $0xac] ss:$16 sps:$4 sm:$0xff]   ;;  %v4132_v46 = vld [vmem:[#allocation12 + $0xa8] ss:$16 sps:$4 sm:$0xff]   ;;  %v4169_v56 = vrot.slane %v129_v54, %v141_v53  ;;  %v4175_v59 = vrot.slane %v129_v54, %v145_v55  ;;  %v138_v27 = vrot.slane %v129_v54, %v137_v18 }
  0x7e   :  { %566 = vmatpush1.bf16.msra.mxu1 %v4034_v14  ;;  %309 = vmatprep.mubr.bf16.mxu1 %v4665_v0  ;;  %v4135_v47 = vld [vmem:[#allocation12 + $0xcc] ss:$16 sps:$4 sm:$0xff]   ;;  %v4138_v48 = vld [vmem:[#allocation12 + $0xc8] ss:$16 sps:$4 sm:$0xff]  }
  0x7f   :  { %567 = vmatprep.subr.bf16.mxu1 %v4037_v15  ;;  %v4141_v49 = vld [vmem:[#allocation12 + $0xec] ss:$16 sps:$4 sm:$0xff]   ;;  %v4144_v50 = vld [vmem:[#allocation12 + $0xe8] ss:$16 sps:$4 sm:$0xff]  }
  0x80   :  { %873 = vmatpush1.bf16.msra.mxu0 %v4026_v9 }
  0x81   :  { %874 = vmatprep.subr.bf16.mxu0 %v4031_v12 }
  0x82   :  { %568 = vmatpush1.bf16.msra.mxu1 %v4039_v16 }
  0x83   :  { %569 = vmatprep.subr.bf16.mxu1 %v4045_v21  ;;  %3052 = vmatmul.mubr.msk.bf16.gmra.mrb[4].mxu0 %vm171_vm0, %v122_v13  ;;  %v133_v13 = vsub.s32 0, %v132_v52 }
  0x84   :  { %875 = vmatpush1.bf16.msra.mxu0 %v4034_v14  ;;  %236 = vmatprep.mubr.bf16.mxu0 %v4665_v0 }
  0x85   :  { %3057 = vmatmul.mubr.msk.bf16.gmra.mrb[8].mxu1 %vm171_vm0, %v123_v22  ;;  %876 = vmatprep.subr.bf16.mxu0 %v4037_v15  ;;  %v134_v20 = vrot.slane %v129_v54, %v133_v13 }
  0x86   :  { %570 = vmatpush1.bf16.msra.mxu1 %v4049_v23  ;;  %319 = vmatprep.mubr.bf16.mxu1 %v4665_v0 }
  0x87   :  { %571 = vmatprep.subr.bf16.mxu1 %v4052_v24 }
  0x88   :  { %877 = vmatpush1.bf16.msra.mxu0 %v4039_v16 }
  0x89   :  { %878 = vmatprep.subr.bf16.mxu0 %v4045_v21 }
  0x8a   :  { %572 = vmatpush1.bf16.msra.mxu1 %v4058_v25 }
  0x8b   :  { %573 = vmatprep.subr.bf16.mxu1 %v4064_v28  ;;  %3053 = vmatmul.mubr.msk.bf16.gmra.mrb[8].mxu0 %vm171_vm0, %v123_v22 }
  0x8c   :  { %879 = vmatpush1.bf16.msra.mxu0 %v4049_v23  ;;  %246 = vmatprep.mubr.bf16.mxu0 %v4665_v0 }
  0x8d   :  { %3058 = vmatmul.mubr.msk.bf16.gmra.mrb[12].mxu1 %vm171_vm0, %v124_v29  ;;  %880 = vmatprep.subr.bf16.mxu0 %v4052_v24 }
  0x8e   :  { %574 = vmatpush1.bf16.msra.mxu1 %v4067_v30  ;;  %593 = vmatprep.mubr.bf16.mxu1 %v4665_v0 }
  0x8f   :  { %575 = vmatprep.subr.bf16.mxu1 %v4071_v31 }
  0x90   :  { %881 = vmatpush1.bf16.msra.mxu0 %v4058_v25 }
  0x91   :  { %882 = vmatprep.subr.bf16.mxu0 %v4064_v28 }
  0x92   :  { %576 = vmatpush1.bf16.msra.mxu1 %v4075_v32 }
  0x93   :  { %602 = vmatprep.subr.bf16.mxu1 %v4080_v34  ;;  %3054 = vmatmul.mubr.msk.bf16.gmra.mrb[12].mxu0 %vm171_vm0, %v124_v29 }
  0x94   :  { %883 = vmatpush1.bf16.msra.mxu0 %v4067_v30  ;;  %902 = vmatprep.mubr.bf16.mxu0 %v4665_v0 }
  0x95   :  { %594 = vmatmul.mubr.bf16.vlgmr.msra.gmra.mrb[16].mxu1 %v368_v36  ;;  %884 = vmatprep.subr.bf16.mxu0 %v4071_v31 }
  0x96   :  { %603 = vmatpush1.bf16.msra.mxu1 %v4086_v35  ;;  %634 = vmatprep.mubr.bf16.mxu1 %v4665_v0 }
  0x97   :  { %604 = vmatprep.subr.bf16.mxu1 %v4089_v37 }
  0x98   :  { %885 = vmatpush1.bf16.msra.mxu0 %v4075_v32 }
  0x99   :  { %1180 = vmatprep.subr.bf16.mxu0 %v4020_v7 }
  0x9a   :  { %605 = vmatpush1.bf16.msra.mxu1 %v4095_v38 }
  0x9b   :  { %606 = vmatprep.subr.bf16.mxu1 %v4099_v39 }
  0x9e   :  { %607 = vmatpush1.bf16.msra.mxu1 %v4105_v40 }
  0x9f   :  { %608 = vmatprep.subr.bf16.mxu1 %v4108_v41 }
  0xa2   :  { %609 = vmatpush1.bf16.msra.mxu1 %v4118_v42 }
  0xa3   :  { %610 = vmatprep.subr.bf16.mxu1 %v4121_v43 }
  0xa6   :  { %611 = vmatpush1.bf16.msra.mxu1 %v4126_v44 }
  0xa7   :  { %612 = vmatprep.subr.bf16.mxu1 %v4129_v45 }
  0xaa   :  { %613 = vmatpush1.bf16.msra.mxu1 %v4132_v46 }
  0xab   :  { %614 = vmatprep.subr.bf16.mxu1 %v4135_v47 }
  0xae   :  { %615 = vmatpush1.bf16.msra.mxu1 %v4138_v48 }
  0xaf   :  { %616 = vmatprep.subr.bf16.mxu1 %v4141_v49 }
  0xb2   :  { %617 = vmatpush1.bf16.msra.mxu1 %v4144_v50 }
  0xb3   :  { %911 = vmatprep.subr.bf16.mxu1 %v4080_v34 }
  0xb5   :  { %635 = vmatmul.mubr.bf16.vlgmr.msra.gmra.mrb[20].mxu1 %v368_v36 }
  0xb6   :  { %912 = vmatpush1.bf16.msra.mxu1 %v4086_v35  ;;  %943 = vmatprep.mubr.bf16.mxu1 %v4665_v0 }
  0xb7   :  { %913 = vmatprep.subr.bf16.mxu1 %v4089_v37 }
  0xba   :  { %914 = vmatpush1.bf16.msra.mxu1 %v4095_v38 }
  0xbb   :  { %915 = vmatprep.subr.bf16.mxu1 %v4099_v39 }
  0xbe   :  { %916 = vmatpush1.bf16.msra.mxu1 %v4105_v40 }
  0xbf   :  { %917 = vmatprep.subr.bf16.mxu1 %v4108_v41 }
  0xc2   :  { %918 = vmatpush1.bf16.msra.mxu1 %v4118_v42 }
  0xc3   :  { %919 = vmatprep.subr.bf16.mxu1 %v4121_v43 }
  0xc6   :  { %920 = vmatpush1.bf16.msra.mxu1 %v4126_v44 }
  0xc7   :  { %921 = vmatprep.subr.bf16.mxu1 %v4129_v45 }
  0xca   :  { %922 = vmatpush1.bf16.msra.mxu1 %v4132_v46 }
  0xcb   :  { %923 = vmatprep.subr.bf16.mxu1 %v4135_v47 }
  0xce   :  { %924 = vmatpush1.bf16.msra.mxu1 %v4138_v48 }
  0xcf   :  { %925 = vmatprep.subr.bf16.mxu1 %v4141_v49 }
  0xd2   :  { %926 = vmatpush1.bf16.msra.mxu1 %v4144_v50 }
  0xd3   :  { %1221 = vmatprep.subr.bf16.mxu1 %v4080_v34 }
 0x148   :  { %v4171_v57 = vpop.f32.mrb[0].mxu1 }
 0x149   :  { %v4173_v58 = vpop.f32.mrb[1].mxu1 }
 0x14a   :  { %v295_v60 = vpop.f32.mrb[2].mxu1 }
 0x14b   :  { %v4178_v61 = vadd.f32 %v295_v60, %v4169_v56  ;;  %v297_v62 = vpop.f32.mrb[3].mxu1 }
 0x14c   :  { %v4181_v63 = vadd.f32 %v297_v62, %v4175_v59 }
 0x14e   :  { %v218_v19 = vpop.f32.mrb[0].mxu0 }
 0x14f   :  { %v220_v22 = vpop.f32.mrb[1].mxu0 }
 0x150   :  { %v301_v1 = vpop.f32.mrb[4].mxu1  ;;  %v222_v29 = vpop.f32.mrb[2].mxu0 }
 0x151   :  { %v4184_v2 = vadd.f32 %v301_v1, %v4169_v56  ;;  %v303_v3 = vpop.f32.mrb[5].mxu1  ;;  %v4198_v51 = vadd.f32 %v222_v29, %v134_v20  ;;  %v224_v53 = vpop.f32.mrb[3].mxu0 }
 0x152   :  { %v4187_v4 = vadd.f32 %v303_v3, %v4175_v59  ;;  %v305_v5 = vpop.f32.mrb[6].mxu1  ;;  %v4203_v62 = vadd.f32 %v224_v53, %v138_v27 }
 0x153   :  { %v4190_v10 = vadd.f32 %v305_v5, %v4169_v56  ;;  %v307_v11 = vpop.f32.mrb[7].mxu1 }
 0x154   :  { %4667 = vst [vmem:[#allocation25_spill] sm:$0xff] %v4187_v4  ;;  %v4193_v17 = vadd.f32 %v307_v11, %v4175_v59 }
 0x155   :  { %4668 = vst [vmem:[#allocation26_spill] sm:$0xff] %v4190_v10 }
 0x156   :  { %4669 = vst [vmem:[#allocation27_spill] sm:$0xff] %v4193_v17  ;;  %v228_v3 = vpop.f32.mrb[4].mxu0 }
 0x157   :  { %v4211_v5 = vadd.f32 %v228_v3, %v134_v20  ;;  %v230_v11 = vpop.f32.mrb[5].mxu0 }
 0x158   :  { %v311_v26 = vpop.f32.mrb[8].mxu1  ;;  %v4213_v18 = vadd.f32 %v230_v11, %v138_v27 }
 0x159   :  { %v4196_v33 = vadd.f32 %v311_v26, %v4169_v56  ;;  %v313_v36 = vpop.f32.mrb[9].mxu1  ;;  %v232_v26 = vpop.f32.mrb[6].mxu0 }
 0x15a   :  { %v4201_v55 = vadd.f32 %v313_v36, %v4175_v59  ;;  %v315_v60 = vpop.f32.mrb[10].mxu1  ;;  %v4218_v53 = vadd.f32 %v232_v26, %v134_v20 }
 0x15b   :  { %4670 = vst [vmem:[#allocation28_spill] sm:$0xff] %v4196_v33  ;;  %v4206_v52 = vadd.f32 %v315_v60, %v4169_v56  ;;  %v317_v1 = vpop.f32.mrb[11].mxu1  ;;  %v234_v60 = vpop.f32.mrb[7].mxu0 }
 0x15c   :  { %4671 = vst [vmem:[#allocation29_spill] sm:$0xff] %v4201_v55  ;;  %v4209_v54 = vadd.f32 %v317_v1, %v4175_v59  ;;  %4675 = vst [vmem:[#allocation33_spill] sm:$0xff] %v4218_v53  ;;  %v219_v55 = vadd.f32 %v218_v19, %v134_v20 }
 0x15d   :  { %4672 = vst [vmem:[#allocation30_spill] sm:$0xff] %v4206_v52 }
 0x15e   :  { %4673 = vst [vmem:[#allocation31_spill] sm:$0xff] %v4209_v54  ;;  %v4223_v54 = vadd.f32 %v234_v60, %v138_v27 }
 0x160   :  { %v321_v13 = vpop.f32.mrb[12].mxu1  ;;  %4677 = vst [vmem:[#allocation35_spill] sm:$0xff] %v4223_v54 }
 0x161   :  { %v4216_v29 = vadd.f32 %v321_v13, %v4169_v56  ;;  %v323_v36 = vpop.f32.mrb[13].mxu1  ;;  %v221_v13 = vadd.f32 %v220_v22, %v138_v27 }
 0x162   :  { %v4221_v0 = vadd.f32 %v323_v36, %v4175_v59  ;;  %v325_v1 = vpop.f32.mrb[14].mxu1 }
 0x163   :  { %4674 = vst [vmem:[#allocation32_spill] sm:$0xff] %v4216_v29  ;;  %v4226_v3 = vadd.f32 %v325_v1, %v4169_v56  ;;  %v327_v52 = vpop.f32.mrb[15].mxu1  ;;  %v238_v29 = vpop.f32.mrb[8].mxu0 }
 0x164   :  { %4676 = vst [vmem:[#allocation34_spill] sm:$0xff] %v4221_v0  ;;  %v4229_v11 = vadd.f32 %v327_v52, %v4175_v59  ;;  %v4231_v33 = vadd.f32 %v238_v29, %v134_v20  ;;  %v240_v26 = vpop.f32.mrb[9].mxu0 }
 0x165   :  { %4678 = vst [vmem:[#allocation36_spill] sm:$0xff] %v4226_v3  ;;  %v4233_v10 = vadd.f32 %v240_v26, %v138_v27  ;;  %v242_v36 = vpop.f32.mrb[10].mxu0 }
 0x166   :  { %4679 = vst [vmem:[#allocation37_spill] sm:$0xff] %v4229_v11  ;;  %4680 = vst [vmem:[#allocation38_spill] sm:$0xff] %v4231_v33  ;;  %v4235_v54 = vadd.f32 %v242_v36, %v134_v20  ;;  %v244_v1 = vpop.f32.mrb[11].mxu0 }
 0x167   :  { %4681 = vst [vmem:[#allocation39_spill] sm:$0xff] %v4233_v10  ;;  %v4237_v4 = vadd.f32 %v244_v1, %v138_v27  ;;  %v248_v19 = vpop.f32.mrb[12].mxu0  ;;  %v292_v1 = vadd.f32 %v4171_v57, %v4169_v56 }
 0x168   :  { %v595_v17 = vpop.f32.mrb[16].mxu1  ;;  %v4239_v22 = vadd.f32 %v248_v19, %v134_v20  ;;  %v250_v29 = vpop.f32.mrb[13].mxu0  ;;  %v294_v19 = vadd.f32 %v4173_v58, %v4175_v59 }
 0x169   :  { %v643_v0 = vadd.f32 %v595_v17, %v219_v55  ;;  %v597_v60 = vpop.f32.mrb[17].mxu1  ;;  %v4241_v11 = vadd.f32 %v250_v29, %v138_v27  ;;  %v252_v33 = vpop.f32.mrb[14].mxu0 }
 0x16a   :  { %v644_v3 = vadd.f32 %v597_v60, %v221_v13  ;;  %v599_v53 = vpop.f32.mrb[18].mxu1  ;;  %v4243_v26 = vadd.f32 %v252_v33, %v134_v20  ;;  %v254_v10 = vpop.f32.mrb[15].mxu0 }
 0x16b   :  { %v600_v52 = vpop.f32.mrb[19].mxu1  ;;  %v4245_v17 = vadd.f32 %v254_v10, %v138_v27  ;;  %v3091_v36 = vmul.f32 -1.442695, %v643_v0 }
 0x16c   :  { %4682 = vst [vmem:[#allocation40_spill] sm:$0xff] %v4243_v26  ;;  %v3092_v55 = vmul.f32 -1.442695, %v644_v3 }
 0x16d   :  { %4683 = vst [vmem:[#allocation41_spill] sm:$0xff] %v4245_v17 }
 0x16e   :  { %3519 = vpow2.f32 %v3092_v55 }
 0x16f   :  { %3521 = vpow2.f32 %v3091_v36  ;;  %v363_v36 = vld [vmem:[#allocation9] sm:$0xff] }
 0x178   :  { %v3520_v53 = vpop.eup %3519 }
 0x179   :  { %v3522_v13 = vpop.eup %3521  ;;  %v657_v60 = vadd.f32 1.0, %v3520_v53 }
 0x17a   :  { %v656_v52 = vadd.f32 1.0, %v3522_v13 }
 0x17b   :  { %3523 = vrcp.f32 %v657_v60 }
 0x17c   :  { %3525 = vrcp.f32 %v656_v52 }
 0x185   :  { %v3524_v55 = vpop.eup %3523 }
 0x186   :  { %v3526_v53 = vpop.eup %3525  ;;  %v666_v57 = vmul.f32 %v3524_v55, %v363_v36 }
 0x188   :  { %v636_v29 = vpop.f32.mrb[20].mxu1 }
 0x189   :  { %v645_v20 = vadd.f32 %v636_v29, %v292_v1  ;;  %v638_v33 = vpop.f32.mrb[21].mxu1 }
 0x18a   :  { %v646_v10 = vadd.f32 %v638_v33, %v294_v19  ;;  %v640_v27 = vpop.f32.mrb[22].mxu1 }
 0x18b   :  { %v3093_v0 = vmul.f32 -1.442695, %v645_v20  ;;  %v641_v3 = vpop.f32.mrb[23].mxu1 }
 0x18c   :  { %3527 = vtanh.f32 %v646_v10 }
 0x18d   :  { %3529 = vpow2.f32 %v3093_v0 }
 0x196   :  { %v3528_v17 = vpop.eup %3527 }
 0x197   :  { %v3530_v56 = vpop.eup %3529  ;;  %v667_v13 = vmul.f32 %v3528_v17, %v3526_v53 }
 0x198   :  { %v658_v26 = vadd.f32 1.0, %v3530_v56 }
 0x199   :  { %v4251_v58 = vadd.f32 %v667_v13, %v666_v57 }
 0x19a   :  { %3531 = vrcp.f32 %v658_v26  ;;  %v4684_v26 = vmov 0  }
 0x19b   :  { %3533 = vtanh.f32 %v4251_v58 }
 0x1a4   :  { %v3532_v59 = vpop.eup %3531 }
 0x1a5   :  { %v3534_v60 = vpop.eup %3533 }
 0x1a6   :  { %v4254_v1 = vmul.f32 %v3534_v60, %v3532_v59 }
 0x1a8   :  { %v677_v52 = vpack.c.bf16 %v4254_v1, %v4254_v1 }
 0x1aa   :  { %903 = vmatmul.mubr.bf16.vlgmr.msra.gmra.mrb[16].mxu0 %v677_v52  ;;  %944 = vmatmul.mubr.bf16.vlgmr.msra.gmra.mrb[24].mxu1 %v677_v52 }
 0x1ab   :  { %1181 = vmatpush1.bf16.msra.mxu0 %v4018_v6  ;;  %1222 = vmatpush1.bf16.msra.mxu1 %v4086_v35 }
 0x1ac   :  { %1182 = vmatprep.subr.bf16.mxu0 %v4022_v8  ;;  %1223 = vmatprep.subr.bf16.mxu1 %v4089_v37 }
 0x1ad   :  { %1212 = vmatprep.mubr.bf16.mxu0 %v4684_v26  ;;  %1253 = vmatprep.mubr.bf16.mxu1 %v4684_v26 }
 0x1af   :  { %1183 = vmatpush1.bf16.msra.mxu0 %v4026_v9  ;;  %1224 = vmatpush1.bf16.msra.mxu1 %v4095_v38 }
 0x1b0   :  { %1184 = vmatprep.subr.bf16.mxu0 %v4031_v12  ;;  %1225 = vmatprep.subr.bf16.mxu1 %v4099_v39 }
 0x1b3   :  { %1185 = vmatpush1.bf16.msra.mxu0 %v4034_v14  ;;  %1226 = vmatpush1.bf16.msra.mxu1 %v4105_v40 }
 0x1b4   :  { %1186 = vmatprep.subr.bf16.mxu0 %v4037_v15  ;;  %1227 = vmatprep.subr.bf16.mxu1 %v4108_v41 }
 0x1b7   :  { %1187 = vmatpush1.bf16.msra.mxu0 %v4039_v16  ;;  %1228 = vmatpush1.bf16.msra.mxu1 %v4118_v42 }
 0x1b8   :  { %1188 = vmatprep.subr.bf16.mxu0 %v4045_v21  ;;  %1229 = vmatprep.subr.bf16.mxu1 %v4121_v43 }
 0x1bb   :  { %1189 = vmatpush1.bf16.msra.mxu0 %v4049_v23  ;;  %1230 = vmatpush1.bf16.msra.mxu1 %v4126_v44 }
 0x1bc   :  { %1190 = vmatprep.subr.bf16.mxu0 %v4052_v24  ;;  %1231 = vmatprep.subr.bf16.mxu1 %v4129_v45 }
 0x1bf   :  { %1191 = vmatpush1.bf16.msra.mxu0 %v4058_v25  ;;  %1232 = vmatpush1.bf16.msra.mxu1 %v4132_v46 }
 0x1c0   :  { %1192 = vmatprep.subr.bf16.mxu0 %v4064_v28  ;;  %1233 = vmatprep.subr.bf16.mxu1 %v4135_v47 }
 0x1c3   :  { %1193 = vmatpush1.bf16.msra.mxu0 %v4067_v30  ;;  %1234 = vmatpush1.bf16.msra.mxu1 %v4138_v48 }
 0x1c4   :  { %1194 = vmatprep.subr.bf16.mxu0 %v4071_v31  ;;  %1235 = vmatprep.subr.bf16.mxu1 %v4141_v49 }
 0x1c7   :  { %1195 = vmatpush1.bf16.msra.mxu0 %v4075_v32  ;;  %1236 = vmatpush1.bf16.msra.mxu1 %v4144_v50 }
 0x1c8   :  { %1490 = vmatprep.subr.bf16.mxu0 %v4020_v7  ;;  %1531 = vmatprep.subr.bf16.mxu1 %v4080_v34 }
 0x27d   :  { %v904_v24 = vpop.f32.mrb[16].mxu0  ;;  %v945_v25 = vpop.f32.mrb[24].mxu1 }
 0x27e   :  { %v952_v28 = vadd.f32 %v904_v24, %v4198_v51  ;;  %v954_v30 = vadd.f32 %v945_v25, %v4178_v61  ;;  %v906_v17 = vpop.f32.mrb[17].mxu0  ;;  %v947_v19 = vpop.f32.mrb[25].mxu1 }
 0x27f   :  { %v953_v31 = vadd.f32 %v906_v17, %v4203_v62  ;;  %v955_v29 = vadd.f32 %v947_v19, %v4181_v63  ;;  %v908_v20 = vpop.f32.mrb[18].mxu0  ;;  %v949_v32 = vpop.f32.mrb[26].mxu1 }
 0x280   :  { %v3126_v33 = vmul.f32 -1.442695, %v952_v28  ;;  %v909_v10 = vpop.f32.mrb[19].mxu0  ;;  %v950_v27 = vpop.f32.mrb[27].mxu1  ;;  %v3128_v34 = vmul.f32 -1.442695, %v954_v30 }
 0x281   :  { %v3127_v7 = vmul.f32 -1.442695, %v953_v31  ;;  %v4362_v10 = vld [vmem:[#allocation12 + $0x4] ss:$16 sps:$4 sm:$0xff]   ;;  %v4364_v27 = vld [vmem:[#allocation12 + $0xc] ss:$16 sps:$4 sm:$0xff]  }
 0x282   :  { %3535 = vpow2.f32 %v3126_v33 }
 0x283   :  { %3537 = vpow2.f32 %v3127_v7  ;;  %v4366_v7 = vld [vmem:[#allocation12] ss:$16 sps:$4 sm:$0xff]  }
 0x284   :  { %3539 = vtanh.f32 %v955_v29 }
 0x285   :  { %3541 = vpow2.f32 %v3128_v34  ;;  %v4368_v34 = vld [vmem:[#allocation12 + $0x8] ss:$16 sps:$4 sm:$0xff]  }
 0x28c   :  { %v3536_v0 = vpop.eup %3535 }
 0x28d   :  { %v965_v3 = vadd.f32 1.0, %v3536_v0  ;;  %v3538_v51 = vpop.eup %3537  ;;  %v4374_v0 = vld [vmem:[#allocation12 + $0x24] ss:$16 sps:$4 sm:$0xff]  }
 0x28e   :  { %v966_v61 = vadd.f32 1.0, %v3538_v51  ;;  %v3540_v62 = vpop.eup %3539  ;;  %v4378_v51 = vld [vmem:[#allocation12 + $0x20] ss:$16 sps:$4 sm:$0xff]  }
 0x28f   :  { %3543 = vrcp.f32 %v965_v3  ;;  %v3542_v55 = vpop.eup %3541  ;;  %v4376_v3 = vld [vmem:[#allocation12 + $0x2c] ss:$16 sps:$4 sm:$0xff]  }
 0x290   :  { %3545 = vrcp.f32 %v966_v61  ;;  %v967_v56 = vadd.f32 1.0, %v3542_v55  ;;  %v4380_v61 = vld [vmem:[#allocation12 + $0x28] ss:$16 sps:$4 sm:$0xff]   ;;  %v4388_v55 = vld [vmem:[#allocation12 + $0x4c] ss:$16 sps:$4 sm:$0xff]  }
 0x292   :  { %3547 = vrcp.f32 %v967_v56  ;;  %v4400_v56 = vld [vmem:[#allocation12 + $0x6c] ss:$16 sps:$4 sm:$0xff]  }
 0x299   :  { %v3544_v63 = vpop.eup %3543 }
 0x29a   :  { %v976_v36 = vmul.f32 %v3544_v63, %v3540_v62  ;;  %v3546_v53 = vpop.eup %3545  ;;  %v4386_v62 = vld [vmem:[#allocation12 + $0x44] ss:$16 sps:$4 sm:$0xff]   ;;  %v4390_v63 = vld [vmem:[#allocation12 + $0x40] ss:$16 sps:$4 sm:$0xff]  }
 0x29b   :  { %v975_v57 = vmul.f32 %v3546_v53, %v4251_v58  ;;  %v4398_v53 = vld [vmem:[#allocation12 + $0x64] ss:$16 sps:$4 sm:$0xff]  }
 0x29c   :  { %v3548_v59 = vpop.eup %3547 }
 0x29d   :  { %v4297_v13 = vadd.f32 %v976_v36, %v975_v57  ;;  %v4392_v36 = vld [vmem:[#allocation12 + $0x48] ss:$16 sps:$4 sm:$0xff]   ;;  %v4402_v57 = vld [vmem:[#allocation12 + $0x60] ss:$16 sps:$4 sm:$0xff]  }
 0x29f   :  { %3549 = vtanh.f32 %v4297_v13 }
 0x2a9   :  { %v3550_v60 = vpop.eup %3549 }
 0x2aa   :  { %v4300_v52 = vmul.f32 %v3550_v60, %v3548_v59  ;;  %v4410_v59 = vld [vmem:[#allocation12 + $0x84] ss:$16 sps:$4 sm:$0xff]   ;;  %v4412_v60 = vld [vmem:[#allocation12 + $0x8c] ss:$16 sps:$4 sm:$0xff]  }
 0x2ac   :  { %v987_v24 = vpack.c.bf16 %v4300_v52, %v4300_v52 }
 0x2ae   :  { %1213 = vmatmul.mubr.bf16.vlgmr.msra.gmra.mrb[20].mxu0 %v987_v24  ;;  %1254 = vmatmul.mubr.bf16.vlgmr.msra.gmra.mrb[28].mxu1 %v987_v24  ;;  %v4414_v24 = vld [vmem:[#allocation12 + $0x80] ss:$16 sps:$4 sm:$0xff]  }
 0x2af   :  { %1491 = vmatpush1.bf16.msra.mxu0 %v4018_v6  ;;  %1532 = vmatpush1.bf16.msra.mxu1 %v4086_v35  ;;  %v4330_v6 = vld [vmem:[#allocation12 + $0xa0] ss:$16 sps:$4 sm:$0xff]  }
 0x2b0   :  { %1492 = vmatprep.subr.bf16.mxu0 %v4022_v8  ;;  %1533 = vmatprep.subr.bf16.mxu1 %v4089_v37  ;;  %v4332_v8 = vld [vmem:[#allocation12 + $0xa4] ss:$16 sps:$4 sm:$0xff]  }
 0x2b1   :  { %1522 = vmatprep.mubr.bf16.mxu0 %v4684_v26  ;;  %1563 = vmatprep.mubr.bf16.mxu1 %v4684_v26 }
 0x2b3   :  { %1493 = vmatpush1.bf16.msra.mxu0 %v4026_v9  ;;  %1534 = vmatpush1.bf16.msra.mxu1 %v4095_v38  ;;  %v4334_v9 = vld [vmem:[#allocation12 + $0xc4] ss:$16 sps:$4 sm:$0xff]  }
 0x2b4   :  { %1494 = vmatprep.subr.bf16.mxu0 %v4031_v12  ;;  %1535 = vmatprep.subr.bf16.mxu1 %v4099_v39  ;;  %v4338_v12 = vld [vmem:[#allocation12 + $0xc0] ss:$16 sps:$4 sm:$0xff]  }
 0x2b7   :  { %1495 = vmatpush1.bf16.msra.mxu0 %v4034_v14  ;;  %1536 = vmatpush1.bf16.msra.mxu1 %v4105_v40  ;;  %v4341_v14 = vld [vmem:[#allocation12 + $0xe4] ss:$16 sps:$4 sm:$0xff]  }
 0x2b8   :  { %1496 = vmatprep.subr.bf16.mxu0 %v4037_v15  ;;  %1537 = vmatprep.subr.bf16.mxu1 %v4108_v41  ;;  %v4344_v15 = vld [vmem:[#allocation12 + $0xe0] ss:$16 sps:$4 sm:$0xff]  }
 0x2b9   :  { %v4685_v40 = vld [vmem:[#allocation25_spill] sm:$0xff] }
 0x2bb   :  { %1497 = vmatpush1.bf16.msra.mxu0 %v4039_v16  ;;  %1538 = vmatpush1.bf16.msra.mxu1 %v4118_v42 }
 0x2bc   :  { %1498 = vmatprep.subr.bf16.mxu0 %v4045_v21  ;;  %1539 = vmatprep.subr.bf16.mxu1 %v4121_v43 }
 0x2bf   :  { %1499 = vmatpush1.bf16.msra.mxu0 %v4049_v23  ;;  %1540 = vmatpush1.bf16.msra.mxu1 %v4126_v44 }
 0x2c0   :  { %1541 = vmatprep.subr.bf16.mxu1 %v4129_v45  ;;  %1500 = vmatprep.subr.bf16.mxu0 %v4332_v8 }
 0x2c3   :  { %1542 = vmatpush1.bf16.msra.mxu1 %v4132_v46  ;;  %1501 = vmatpush1.bf16.msra.mxu0 %v4330_v6 }
 0x2c4   :  { %1543 = vmatprep.subr.bf16.mxu1 %v4135_v47  ;;  %1502 = vmatprep.subr.bf16.mxu0 %v4334_v9 }
 0x2c7   :  { %1544 = vmatpush1.bf16.msra.mxu1 %v4138_v48  ;;  %1503 = vmatpush1.bf16.msra.mxu0 %v4338_v12 }
 0x2c8   :  { %1545 = vmatprep.subr.bf16.mxu1 %v4141_v49  ;;  %1504 = vmatprep.subr.bf16.mxu0 %v4341_v14 }
 0x2cb   :  { %1546 = vmatpush1.bf16.msra.mxu1 %v4144_v50  ;;  %1505 = vmatpush1.bf16.msra.mxu0 %v4344_v15 }
 0x2cc   :  { %1800 = vmatprep.subr.bf16.mxu0 %v4362_v10  ;;  %1841 = vmatprep.subr.bf16.mxu1 %v4364_v27 }
 0x381   :  { %v1214_v16 = vpop.f32.mrb[20].mxu0  ;;  %v1255_v21 = vpop.f32.mrb[28].mxu1 }
 0x382   :  { %v1262_v23 = vadd.f32 %v1214_v16, %v4211_v5  ;;  %v1264_v35 = vadd.f32 %v1255_v21, %v4184_v2  ;;  %v1216_v37 = vpop.f32.mrb[21].mxu0  ;;  %v1257_v38 = vpop.f32.mrb[29].mxu1  ;;  %v4416_v16 = vld [vmem:[#allocation12 + $0x88] ss:$16 sps:$4 sm:$0xff]  }
 0x383   :  { %v1263_v39 = vadd.f32 %v1216_v37, %v4213_v18  ;;  %v1265_v41 = vadd.f32 %v1257_v38, %v4685_v40  ;;  %v1218_v42 = vpop.f32.mrb[22].mxu0  ;;  %v1259_v43 = vpop.f32.mrb[30].mxu1  ;;  %v4422_v21 = vld [vmem:[#allocation12 + $0xa8] ss:$16 sps:$4 sm:$0xff]   ;;  %v4436_v38 = vld [vmem:[#allocation12 + $0xec] ss:$16 sps:$4 sm:$0xff]  }
 0x384   :  { %v3161_v44 = vmul.f32 -1.442695, %v1262_v23  ;;  %v1219_v45 = vpop.f32.mrb[23].mxu0  ;;  %v1260_v46 = vpop.f32.mrb[31].mxu1  ;;  %v3163_v48 = vmul.f32 -1.442695, %v1264_v35 }
 0x385   :  { %v3162_v47 = vmul.f32 -1.442695, %v1263_v39  ;;  %v4424_v23 = vld [vmem:[#allocation12 + $0xac] ss:$16 sps:$4 sm:$0xff]   ;;  %v4432_v37 = vld [vmem:[#allocation12 + $0xc8] ss:$16 sps:$4 sm:$0xff]  }
 0x386   :  { %3551 = vpow2.f32 %v3161_v44  ;;  %v4427_v35 = vld [vmem:[#allocation12 + $0xcc] ss:$16 sps:$4 sm:$0xff]   ;;  %v4440_v39 = vld [vmem:[#allocation12 + $0xe8] ss:$16 sps:$4 sm:$0xff]   ;;  %v4686_v42 = vld [vmem:[#allocation33_spill] sm:$0xff] }
 0x387   :  { %3553 = vpow2.f32 %v3162_v47  ;;  %v4687_v44 = vld [vmem:[#allocation26_spill] sm:$0xff] }
 0x388   :  { %3555 = vtanh.f32 %v1265_v41 }
 0x389   :  { %3557 = vpow2.f32 %v3163_v48  ;;  %v4688_v48 = vld [vmem:[#allocation35_spill] sm:$0xff] }
 0x390   :  { %v3552_v49 = vpop.eup %3551 }
 0x391   :  { %v1275_v50 = vadd.f32 1.0, %v3552_v49  ;;  %v3554_v5 = vpop.eup %3553 }
 0x392   :  { %v1276_v2 = vadd.f32 1.0, %v3554_v5  ;;  %v3556_v18 = vpop.eup %3555 }
 0x393   :  { %3559 = vrcp.f32 %v1275_v50  ;;  %v3558_v58 = vpop.eup %3557  ;;  %v4689_v50 = vld [vmem:[#allocation27_spill] sm:$0xff] }
 0x394   :  { %3561 = vrcp.f32 %v1276_v2  ;;  %v1277_v17 = vadd.f32 1.0, %v3558_v58 }
 0x396   :  { %3563 = vrcp.f32 %v1277_v17 }
 0x39d   :  { %v3560_v25 = vpop.eup %3559 }
 0x39e   :  { %v1286_v28 = vmul.f32 %v3560_v25, %v3556_v18  ;;  %v3562_v30 = vpop.eup %3561 }
 0x39f   :  { %v1285_v19 = vmul.f32 %v3562_v30, %v4297_v13  ;;  %v4404_v13 = vld [vmem:[#allocation12 + $0x68] ss:$16 sps:$4 sm:$0xff]  }
 0x3a0   :  { %v3564_v29 = vpop.eup %3563 }
 0x3a1   :  { %v4353_v31 = vadd.f32 %v1286_v28, %v1285_v19 }
 0x3a3   :  { %3565 = vtanh.f32 %v4353_v31 }
 0x3ad   :  { %v3566_v20 = vpop.eup %3565 }
 0x3ae   :  { %v4356_v32 = vmul.f32 %v3566_v20, %v3564_v29 }
 0x3b0   :  { %v1297_v33 = vpack.c.bf16 %v4356_v32, %v4356_v32 }
 0x3b2   :  { %1523 = vmatmul.mubr.bf16.vlgmr.msra.gmra.mrb[24].mxu0 %v1297_v33  ;;  %1564 = vmatmul.mubr.bf16.vlgmr.msra.gmra.mrb[32].mxu1 %v1297_v33 }
 0x3b3   :  { %1832 = vmatprep.mubr.bf16.mxu0 %v4684_v26  ;;  %1873 = vmatprep.mubr.bf16.mxu1 %v4684_v26 }
 0x3b4   :  { %1801 = vmatpush1.bf16.msra.mxu0 %v4366_v7  ;;  %1842 = vmatpush1.bf16.msra.mxu1 %v4368_v34 }
 0x3b5   :  { %1802 = vmatprep.subr.bf16.mxu0 %v4374_v0  ;;  %1843 = vmatprep.subr.bf16.mxu1 %v4376_v3 }
 0x3b8   :  { %1803 = vmatpush1.bf16.msra.mxu0 %v4378_v51  ;;  %1844 = vmatpush1.bf16.msra.mxu1 %v4380_v61 }
 0x3b9   :  { %1804 = vmatprep.subr.bf16.mxu0 %v4386_v62  ;;  %1845 = vmatprep.subr.bf16.mxu1 %v4388_v55 }
 0x3bc   :  { %1805 = vmatpush1.bf16.msra.mxu0 %v4390_v63  ;;  %1846 = vmatpush1.bf16.msra.mxu1 %v4392_v36 }
 0x3bd   :  { %1806 = vmatprep.subr.bf16.mxu0 %v4398_v53  ;;  %1847 = vmatprep.subr.bf16.mxu1 %v4400_v56 }
 0x3c0   :  { %1807 = vmatpush1.bf16.msra.mxu0 %v4402_v57  ;;  %1848 = vmatpush1.bf16.msra.mxu1 %v4404_v13 }
 0x3c1   :  { %1808 = vmatprep.subr.bf16.mxu0 %v4410_v59  ;;  %1849 = vmatprep.subr.bf16.mxu1 %v4412_v60 }
 0x3c4   :  { %1809 = vmatpush1.bf16.msra.mxu0 %v4414_v24  ;;  %1850 = vmatpush1.bf16.msra.mxu1 %v4416_v16 }
 0x3c5   :  { %1810 = vmatprep.subr.bf16.mxu0 %v4332_v8  ;;  %1851 = vmatprep.subr.bf16.mxu1 %v4424_v23 }
 0x3c8   :  { %1811 = vmatpush1.bf16.msra.mxu0 %v4330_v6  ;;  %1852 = vmatpush1.bf16.msra.mxu1 %v4422_v21 }
 0x3c9   :  { %1812 = vmatprep.subr.bf16.mxu0 %v4334_v9  ;;  %1853 = vmatprep.subr.bf16.mxu1 %v4427_v35 }
 0x3cc   :  { %1813 = vmatpush1.bf16.msra.mxu0 %v4338_v12  ;;  %1854 = vmatpush1.bf16.msra.mxu1 %v4432_v37 }
 0x3cd   :  { %1814 = vmatprep.subr.bf16.mxu0 %v4341_v14  ;;  %1855 = vmatprep.subr.bf16.mxu1 %v4436_v38 }
 0x3d0   :  { %1815 = vmatpush1.bf16.msra.mxu0 %v4344_v15  ;;  %1856 = vmatpush1.bf16.msra.mxu1 %v4440_v39 }
 0x3d1   :  { %2110 = vmatprep.subr.bf16.mxu0 %v4362_v10  ;;  %2151 = vmatprep.subr.bf16.mxu1 %v4364_v27 }
 0x485   :  { %v1524_v40 = vpop.f32.mrb[24].mxu0  ;;  %v1565_v41 = vpop.f32.mrb[32].mxu1 }
 0x486   :  { %v1572_v43 = vadd.f32 %v1524_v40, %v4686_v42  ;;  %v1574_v45 = vadd.f32 %v1565_v41, %v4687_v44  ;;  %v1526_v46 = vpop.f32.mrb[25].mxu0  ;;  %v1567_v47 = vpop.f32.mrb[33].mxu1 }
 0x487   :  { %v1573_v49 = vadd.f32 %v1526_v46, %v4688_v48  ;;  %v1575_v5 = vadd.f32 %v1567_v47, %v4689_v50  ;;  %v1528_v2 = vpop.f32.mrb[26].mxu0  ;;  %v1569_v18 = vpop.f32.mrb[34].mxu1 }
 0x488   :  { %v3196_v58 = vmul.f32 -1.442695, %v1572_v43  ;;  %v1529_v25 = vpop.f32.mrb[27].mxu0  ;;  %v1570_v28 = vpop.f32.mrb[35].mxu1  ;;  %v3198_v17 = vmul.f32 -1.442695, %v1574_v45 }
 0x489   :  { %v3197_v30 = vmul.f32 -1.442695, %v1573_v49  ;;  %v4690_v18 = vld [vmem:[#allocation38_spill] sm:$0xff]  ;;  %v4691_v25 = vld [vmem:[#allocation28_spill] sm:$0xff] }
 0x48a   :  { %3567 = vpow2.f32 %v3196_v58 }
 0x48b   :  { %3569 = vpow2.f32 %v3197_v30 }
 0x48c   :  { %3571 = vtanh.f32 %v1575_v5 }
 0x48d   :  { %3573 = vpow2.f32 %v3198_v17 }
 0x494   :  { %v3568_v19 = vpop.eup %3567 }
 0x495   :  { %v1585_v29 = vadd.f32 1.0, %v3568_v19  ;;  %v3570_v20 = vpop.eup %3569  ;;  %v4692_v19 = vld [vmem:[#allocation39_spill] sm:$0xff] }
 0x496   :  { %v1586_v33 = vadd.f32 1.0, %v3570_v20  ;;  %v3572_v40 = vpop.eup %3571  ;;  %v4693_v20 = vld [vmem:[#allocation29_spill] sm:$0xff] }
 0x497   :  { %3575 = vrcp.f32 %v1585_v29  ;;  %v3574_v41 = vpop.eup %3573 }
 0x498   :  { %3577 = vrcp.f32 %v1586_v33  ;;  %v1587_v43 = vadd.f32 1.0, %v3574_v41 }
 0x49a   :  { %3579 = vrcp.f32 %v1587_v43 }
 0x4a1   :  { %v3576_v42 = vpop.eup %3575 }
 0x4a2   :  { %v1596_v44 = vmul.f32 %v3576_v42, %v3572_v40  ;;  %v3578_v46 = vpop.eup %3577 }
 0x4a3   :  { %v1595_v47 = vmul.f32 %v3578_v46, %v4353_v31 }
 0x4a4   :  { %v3580_v45 = vpop.eup %3579 }
 0x4a5   :  { %v4453_v48 = vadd.f32 %v1596_v44, %v1595_v47 }
 0x4a7   :  { %3581 = vtanh.f32 %v4453_v48 }
 0x4b1   :  { %v3582_v49 = vpop.eup %3581 }
 0x4b2   :  { %v4456_v50 = vmul.f32 %v3582_v49, %v3580_v45 }
 0x4b4   :  { %v1607_v5 = vpack.c.bf16 %v4456_v50, %v4456_v50 }
 0x4b6   :  { %1833 = vmatmul.mubr.bf16.vlgmr.msra.gmra.mrb[28].mxu0 %v1607_v5  ;;  %1874 = vmatmul.mubr.bf16.vlgmr.msra.gmra.mrb[36].mxu1 %v1607_v5 }
 0x4b7   :  { %2111 = vmatpush1.bf16.msra.mxu0 %v4366_v7  ;;  %2152 = vmatpush1.bf16.msra.mxu1 %v4368_v34 }
 0x4b8   :  { %2112 = vmatprep.subr.bf16.mxu0 %v4374_v0  ;;  %2153 = vmatprep.subr.bf16.mxu1 %v4376_v3 }
 0x4b9   :  { %2142 = vmatprep.mubr.bf16.mxu0 %v4684_v26  ;;  %2183 = vmatprep.mubr.bf16.mxu1 %v4684_v26 }
 0x4bb   :  { %2113 = vmatpush1.bf16.msra.mxu0 %v4378_v51  ;;  %2154 = vmatpush1.bf16.msra.mxu1 %v4380_v61 }
 0x4bc   :  { %2114 = vmatprep.subr.bf16.mxu0 %v4386_v62  ;;  %2155 = vmatprep.subr.bf16.mxu1 %v4388_v55 }
 0x4bf   :  { %2115 = vmatpush1.bf16.msra.mxu0 %v4390_v63  ;;  %2156 = vmatpush1.bf16.msra.mxu1 %v4392_v36 }
 0x4c0   :  { %2116 = vmatprep.subr.bf16.mxu0 %v4398_v53  ;;  %2157 = vmatprep.subr.bf16.mxu1 %v4400_v56 }
 0x4c3   :  { %2117 = vmatpush1.bf16.msra.mxu0 %v4402_v57  ;;  %2158 = vmatpush1.bf16.msra.mxu1 %v4404_v13 }
 0x4c4   :  { %2118 = vmatprep.subr.bf16.mxu0 %v4410_v59  ;;  %2159 = vmatprep.subr.bf16.mxu1 %v4412_v60 }
 0x4c7   :  { %2119 = vmatpush1.bf16.msra.mxu0 %v4414_v24  ;;  %2160 = vmatpush1.bf16.msra.mxu1 %v4416_v16 }
 0x4c8   :  { %2120 = vmatprep.subr.bf16.mxu0 %v4332_v8  ;;  %2161 = vmatprep.subr.bf16.mxu1 %v4424_v23 }
 0x4cb   :  { %2121 = vmatpush1.bf16.msra.mxu0 %v4330_v6  ;;  %2162 = vmatpush1.bf16.msra.mxu1 %v4422_v21 }
 0x4cc   :  { %2122 = vmatprep.subr.bf16.mxu0 %v4334_v9  ;;  %2163 = vmatprep.subr.bf16.mxu1 %v4427_v35 }
 0x4cf   :  { %2123 = vmatpush1.bf16.msra.mxu0 %v4338_v12  ;;  %2164 = vmatpush1.bf16.msra.mxu1 %v4432_v37 }
 0x4d0   :  { %2124 = vmatprep.subr.bf16.mxu0 %v4341_v14  ;;  %2165 = vmatprep.subr.bf16.mxu1 %v4436_v38 }
 0x4d3   :  { %2125 = vmatpush1.bf16.msra.mxu0 %v4344_v15  ;;  %2166 = vmatpush1.bf16.msra.mxu1 %v4440_v39 }
 0x4d4   :  { %2420 = vmatprep.subr.bf16.mxu0 %v4362_v10  ;;  %2461 = vmatprep.subr.bf16.mxu1 %v4364_v27 }
 0x589   :  { %v1834_v31 = vpop.f32.mrb[28].mxu0  ;;  %v1875_v2 = vpop.f32.mrb[36].mxu1 }
 0x58a   :  { %v1882_v58 = vadd.f32 %v1834_v31, %v4690_v18  ;;  %v1884_v28 = vadd.f32 %v1875_v2, %v4691_v25  ;;  %v1836_v30 = vpop.f32.mrb[29].mxu0  ;;  %v1877_v17 = vpop.f32.mrb[37].mxu1 }
 0x58b   :  { %v1883_v29 = vadd.f32 %v1836_v30, %v4692_v19  ;;  %v1885_v33 = vadd.f32 %v1877_v17, %v4693_v20  ;;  %v1838_v40 = vpop.f32.mrb[30].mxu0  ;;  %v1879_v41 = vpop.f32.mrb[38].mxu1 }
 0x58c   :  { %v3231_v42 = vmul.f32 -1.442695, %v1882_v58  ;;  %v1839_v44 = vpop.f32.mrb[31].mxu0  ;;  %v1880_v46 = vpop.f32.mrb[39].mxu1  ;;  %v3233_v47 = vmul.f32 -1.442695, %v1884_v28 }
 0x58d   :  { %v3232_v43 = vmul.f32 -1.442695, %v1883_v29  ;;  %v4695_v44 = vld [vmem:[#allocation31_spill] sm:$0xff] }
 0x58e   :  { %3583 = vpow2.f32 %v3231_v42 }
 0x58f   :  { %3585 = vpow2.f32 %v3232_v43 }
 0x590   :  { %3587 = vtanh.f32 %v1885_v33 }
 0x591   :  { %3589 = vpow2.f32 %v3233_v47 }
 0x598   :  { %v3584_v45 = vpop.eup %3583 }
 0x599   :  { %v1895_v49 = vadd.f32 1.0, %v3584_v45  ;;  %v3586_v5 = vpop.eup %3585 }
 0x59a   :  { %v1896_v31 = vadd.f32 1.0, %v3586_v5  ;;  %v3588_v2 = vpop.eup %3587 }
 0x59b   :  { %3591 = vrcp.f32 %v1895_v49  ;;  %v3590_v18 = vpop.eup %3589 }
 0x59c   :  { %3593 = vrcp.f32 %v1896_v31  ;;  %v1897_v58 = vadd.f32 1.0, %v3590_v18 }
 0x59e   :  { %3595 = vrcp.f32 %v1897_v58 }
 0x5a5   :  { %v3592_v25 = vpop.eup %3591 }
 0x5a6   :  { %v1906_v30 = vmul.f32 %v3592_v25, %v3588_v2  ;;  %v3594_v17 = vpop.eup %3593 }
 0x5a7   :  { %v1905_v19 = vmul.f32 %v3594_v17, %v4453_v48  ;;  %v4694_v48 = vld [vmem:[#allocation30_spill] sm:$0xff] }
 0x5a8   :  { %v3596_v28 = vpop.eup %3595 }
 0x5a9   :  { %v4499_v29 = vadd.f32 %v1906_v30, %v1905_v19 }
 0x5ab   :  { %3597 = vtanh.f32 %v4499_v29 }
 0x5b5   :  { %v3598_v20 = vpop.eup %3597 }
 0x5b6   :  { %v4502_v33 = vmul.f32 %v3598_v20, %v3596_v28 }
 0x5b8   :  { %v1917_v40 = vpack.c.bf16 %v4502_v33, %v4502_v33 }
 0x5ba   :  { %2143 = vmatmul.mubr.bf16.vlgmr.msra.gmra.mrb[32].mxu0 %v1917_v40  ;;  %2184 = vmatmul.mubr.bf16.vlgmr.msra.gmra.mrb[40].mxu1 %v1917_v40 }
 0x5bb   :  { %2421 = vmatpush1.bf16.msra.mxu0 %v4366_v7  ;;  %2462 = vmatpush1.bf16.msra.mxu1 %v4368_v34 }
 0x5bc   :  { %2422 = vmatprep.subr.bf16.mxu0 %v4374_v0  ;;  %2463 = vmatprep.subr.bf16.mxu1 %v4376_v3 }
 0x5bd   :  { %2452 = vmatprep.mubr.bf16.mxu0 %v4684_v26  ;;  %2493 = vmatprep.mubr.bf16.mxu1 %v4684_v26 }
 0x5bf   :  { %2423 = vmatpush1.bf16.msra.mxu0 %v4378_v51  ;;  %2464 = vmatpush1.bf16.msra.mxu1 %v4380_v61 }
 0x5c0   :  { %2424 = vmatprep.subr.bf16.mxu0 %v4386_v62  ;;  %2465 = vmatprep.subr.bf16.mxu1 %v4388_v55 }
 0x5c3   :  { %2425 = vmatpush1.bf16.msra.mxu0 %v4390_v63  ;;  %2466 = vmatpush1.bf16.msra.mxu1 %v4392_v36 }
 0x5c4   :  { %2426 = vmatprep.subr.bf16.mxu0 %v4398_v53  ;;  %2467 = vmatprep.subr.bf16.mxu1 %v4400_v56 }
 0x5c7   :  { %2427 = vmatpush1.bf16.msra.mxu0 %v4402_v57  ;;  %2468 = vmatpush1.bf16.msra.mxu1 %v4404_v13 }
 0x5c8   :  { %2428 = vmatprep.subr.bf16.mxu0 %v4410_v59  ;;  %2469 = vmatprep.subr.bf16.mxu1 %v4412_v60 }
 0x5cb   :  { %2429 = vmatpush1.bf16.msra.mxu0 %v4414_v24  ;;  %2470 = vmatpush1.bf16.msra.mxu1 %v4416_v16 }
 0x5cc   :  { %2430 = vmatprep.subr.bf16.mxu0 %v4332_v8  ;;  %2471 = vmatprep.subr.bf16.mxu1 %v4424_v23 }
 0x5cf   :  { %2431 = vmatpush1.bf16.msra.mxu0 %v4330_v6  ;;  %2472 = vmatpush1.bf16.msra.mxu1 %v4422_v21 }
 0x5d0   :  { %2432 = vmatprep.subr.bf16.mxu0 %v4334_v9  ;;  %2473 = vmatprep.subr.bf16.mxu1 %v4427_v35 }
 0x5d3   :  { %2433 = vmatpush1.bf16.msra.mxu0 %v4338_v12  ;;  %2474 = vmatpush1.bf16.msra.mxu1 %v4432_v37 }
 0x5d4   :  { %2434 = vmatprep.subr.bf16.mxu0 %v4341_v14  ;;  %2475 = vmatprep.subr.bf16.mxu1 %v4436_v38 }
 0x5d7   :  { %2435 = vmatpush1.bf16.msra.mxu0 %v4344_v15  ;;  %2476 = vmatpush1.bf16.msra.mxu1 %v4440_v39 }
 0x5d8   :  { %2730 = vmatprep.subr.bf16.mxu0 %v4362_v10  ;;  %2771 = vmatprep.subr.bf16.mxu1 %v4364_v27 }
 0x68d   :  { %v2144_v6 = vpop.f32.mrb[32].mxu0  ;;  %v2185_v8 = vpop.f32.mrb[40].mxu1 }
 0x68e   :  { %v2192_v9 = vadd.f32 %v2144_v6, %v4235_v54  ;;  %v2194_v12 = vadd.f32 %v2185_v8, %v4694_v48  ;;  %v2146_v41 = vpop.f32.mrb[33].mxu0  ;;  %v2187_v42 = vpop.f32.mrb[41].mxu1 }
 0x68f   :  { %v2193_v14 = vadd.f32 %v2146_v41, %v4237_v4  ;;  %v2195_v46 = vadd.f32 %v2187_v42, %v4695_v44  ;;  %v2148_v43 = vpop.f32.mrb[34].mxu0  ;;  %v2189_v15 = vpop.f32.mrb[42].mxu1 }
 0x690   :  { %v3266_v47 = vmul.f32 -1.442695, %v2192_v9  ;;  %v2149_v45 = vpop.f32.mrb[35].mxu0  ;;  %v2190_v49 = vpop.f32.mrb[43].mxu1  ;;  %v3268_v27 = vmul.f32 -1.442695, %v2194_v12 }
 0x691   :  { %v3267_v10 = vmul.f32 -1.442695, %v2193_v14  ;;  %v3512_v49 = vld [vmem:[#allocation13 + $0x8] sm:$0xff]  }
 0x692   :  { %3599 = vpow2.f32 %v3266_v47 }
 0x693   :  { %3601 = vpow2.f32 %v3267_v10  ;;  %v2852_v10 = vpack.c.bf16 %v4300_v52, %v4254_v1  ;;  %v3518_v1 = vld [vmem:[#allocation13 + $0x38] sm:$0xff]   ;;  %v2853_v52 = vpack.c.bf16 %v4456_v50, %v4356_v32 }
 0x694   :  { %3603 = vtanh.f32 %v2195_v46 }
 0x695   :  { %3605 = vpow2.f32 %v3268_v27  ;;  %v3513_v27 = vld [vmem:[#allocation13 + $0x10] sm:$0xff]  }
 0x69c   :  { %v3600_v5 = vpop.eup %3599 }
 0x69d   :  { %v2205_v31 = vadd.f32 1.0, %v3600_v5  ;;  %v3602_v54 = vpop.eup %3601  ;;  %v3514_v5 = vld [vmem:[#allocation13 + $0x18] sm:$0xff]  }
 0x69e   :  { %v2206_v2 = vadd.f32 1.0, %v3602_v54  ;;  %v3604_v4 = vpop.eup %3603  ;;  %v3516_v54 = vld [vmem:[#allocation13 + $0x28] sm:$0xff]  }
 0x69f   :  { %3607 = vrcp.f32 %v2205_v31  ;;  %v3606_v18 = vpop.eup %3605  ;;  %v3515_v31 = vld [vmem:[#allocation13 + $0x20] sm:$0xff]  }
 0x6a0   :  { %3609 = vrcp.f32 %v2206_v2  ;;  %v2207_v58 = vadd.f32 1.0, %v3606_v18  ;;  %v3517_v2 = vld [vmem:[#allocation13 + $0x30] sm:$0xff]  }
 0x6a2   :  { %3611 = vrcp.f32 %v2207_v58  ;;  %v4699_v58 = vld [vmem:[#allocation36_spill] sm:$0xff] }
 0x6a9   :  { %v3608_v25 = vpop.eup %3607 }
 0x6aa   :  { %v2216_v30 = vmul.f32 %v3608_v25, %v3604_v4  ;;  %v3610_v17 = vpop.eup %3609 }
 0x6ab   :  { %v2215_v19 = vmul.f32 %v3610_v17, %v4499_v29 }
 0x6ac   :  { %v3612_v20 = vpop.eup %3611 }
 0x6ad   :  { %v4545_v28 = vadd.f32 %v2216_v30, %v2215_v19  ;;  %v4698_v30 = vld [vmem:[#allocation40_spill] sm:$0xff] }
 0x6af   :  { %3613 = vtanh.f32 %v4545_v28 }
 0x6b9   :  { %v3614_v40 = vpop.eup %3613 }
 0x6ba   :  { %v4548_v6 = vmul.f32 %v3614_v40, %v3612_v20  ;;  %v4700_v40 = vld [vmem:[#allocation41_spill] sm:$0xff] }
 0x6bc   :  { %v2227_v8 = vpack.c.bf16 %v4548_v6, %v4548_v6  ;;  %v2854_v4 = vpack.c.bf16 %v4548_v6, %v4502_v33 }
 0x6be   :  { %2453 = vmatmul.mubr.bf16.vlgmr.msra.gmra.mrb[36].mxu0 %v2227_v8  ;;  %2494 = vmatmul.mubr.bf16.vlgmr.msra.gmra.mrb[44].mxu1 %v2227_v8 }
 0x6bf   :  { %2731 = vmatpush1.bf16.msra.mxu0 %v4366_v7  ;;  %2772 = vmatpush1.bf16.msra.mxu1 %v4368_v34  ;;  %v3504_v7 = vld [vmem:[#allocation12 + $0xa4] ss:$16 sps:$4 sm:$0xff]  }
 0x6c0   :  { %2732 = vmatprep.subr.bf16.mxu0 %v4374_v0  ;;  %2773 = vmatprep.subr.bf16.mxu1 %v4376_v3  ;;  %v3507_v34 = vld [vmem:[#allocation12 + $0xc4] ss:$16 sps:$4 sm:$0xff]   ;;  %v3505_v0 = vld [vmem:[#allocation12 + $0xc0] ss:$16 sps:$4 sm:$0xff]  }
 0x6c1   :  { %2762 = vmatprep.mubr.bf16.mxu0 %v4684_v26  ;;  %2803 = vmatprep.mubr.bf16.mxu1 %v4684_v26  ;;  %v3502_v26 = vld [vmem:[#allocation12 + $0xa0] ss:$16 sps:$4 sm:$0xff]   ;;  %v3510_v3 = vld [vmem:[#allocation12 + $0xe4] ss:$16 sps:$4 sm:$0xff]  }
 0x6c3   :  { %2733 = vmatpush1.bf16.msra.mxu0 %v4378_v51  ;;  %2774 = vmatpush1.bf16.msra.mxu1 %v4380_v61  ;;  %v3508_v51 = vld [vmem:[#allocation12 + $0xe0] ss:$16 sps:$4 sm:$0xff]  }
 0x6c4   :  { %2734 = vmatprep.subr.bf16.mxu0 %v4386_v62  ;;  %2775 = vmatprep.subr.bf16.mxu1 %v4388_v55  ;;  %v3511_v61 = vld [vmem:[#allocation13] sm:$0xff]  }
 0x6c7   :  { %2735 = vmatpush1.bf16.msra.mxu0 %v4390_v63  ;;  %2776 = vmatpush1.bf16.msra.mxu1 %v4392_v36  ;;  %v4696_v36 = vld [vmem:[#allocation32_spill] sm:$0xff] }
 0x6c8   :  { %2736 = vmatprep.subr.bf16.mxu0 %v4398_v53  ;;  %2777 = vmatprep.subr.bf16.mxu1 %v4400_v56 }
 0x6cb   :  { %2737 = vmatpush1.bf16.msra.mxu0 %v4402_v57  ;;  %2778 = vmatpush1.bf16.msra.mxu1 %v4404_v13 }
 0x6cc   :  { %2738 = vmatprep.subr.bf16.mxu0 %v4410_v59  ;;  %2779 = vmatprep.subr.bf16.mxu1 %v4412_v60  ;;  %v4697_v59 = vld [vmem:[#allocation34_spill] sm:$0xff] }
 0x6cf   :  { %2739 = vmatpush1.bf16.msra.mxu0 %v4414_v24  ;;  %2780 = vmatpush1.bf16.msra.mxu1 %v4416_v16 }
 0x6d0   :  { %2781 = vmatprep.subr.bf16.mxu1 %v4424_v23  ;;  %2740 = vmatprep.subr.bf16.mxu0 %v3504_v7 }
 0x6d3   :  { %2782 = vmatpush1.bf16.msra.mxu1 %v4422_v21  ;;  %2741 = vmatpush1.bf16.msra.mxu0 %v3502_v26  ;;  %v4701_v26 = vld [vmem:[#allocation37_spill] sm:$0xff] }
 0x6d4   :  { %2783 = vmatprep.subr.bf16.mxu1 %v4427_v35  ;;  %2742 = vmatprep.subr.bf16.mxu0 %v3507_v34 }
 0x6d7   :  { %2784 = vmatpush1.bf16.msra.mxu1 %v4432_v37  ;;  %2743 = vmatpush1.bf16.msra.mxu0 %v3505_v0 }
 0x6d8   :  { %2785 = vmatprep.subr.bf16.mxu1 %v4436_v38  ;;  %2744 = vmatprep.subr.bf16.mxu0 %v3510_v3 }
 0x6db   :  { %2786 = vmatpush1.bf16.msra.mxu1 %v4440_v39  ;;  %2745 = vmatpush1.bf16.msra.mxu0 %v3508_v51 }
 0x6dc   :  { %3360 = vmatprep.subr.bf16.mxu0 %v3511_v61 }
 0x791   :  { %v2454_v62 = vpop.f32.mrb[36].mxu0  ;;  %v2495_v55 = vpop.f32.mrb[44].mxu1 }
 0x792   :  { %v2502_v63 = vadd.f32 %v2454_v62, %v4239_v22  ;;  %v2504_v53 = vadd.f32 %v2495_v55, %v4696_v36  ;;  %v2456_v56 = vpop.f32.mrb[37].mxu0  ;;  %v2497_v57 = vpop.f32.mrb[45].mxu1 }
 0x793   :  { %v2503_v13 = vadd.f32 %v2456_v56, %v4241_v11  ;;  %v2505_v60 = vadd.f32 %v2497_v57, %v4697_v59  ;;  %v2458_v24 = vpop.f32.mrb[38].mxu0  ;;  %v2499_v16 = vpop.f32.mrb[46].mxu1  ;;  %v4603_v59 = vld [vmem:[%s4661_s7] ss:$0 sm:$0xff]  ;;  %s3870_s7 = smov [#allocation16]  }
 0x794   :  { %v3301_v21 = vmul.f32 -1.442695, %v2502_v63  ;;  %v2459_v23 = vpop.f32.mrb[39].mxu0  ;;  %v2500_v35 = vpop.f32.mrb[47].mxu1  ;;  %v3303_v38 = vmul.f32 -1.442695, %v2504_v53 }
 0x795   :  { %v3302_v37 = vmul.f32 -1.442695, %v2503_v13  ;;  %s3018_s29 = sshll.u32 %s3870_s7, 4  ;;  %s3019_s29 = int_to_ptr.vmem [resolvable:$true] %s3018_s29 }
 0x796   :  { %3615 = vpow2.f32 %v3301_v21  ;;  %s3779_s30 = scalar_lea.vmem %s3019_s29, 128  ;;  %p3784_p7 = scmp.lt.s32.totalorder %s3019_s29, %s3019_s29 }
 0x797   :  { %3617 = vpow2.f32 %v3302_v37  ;;  %p3780_p6 = scmp.ne.s32.totalorder %s3019_s29, %s3779_s30  ;;  %p3785_p8 = scmp.lt.s32.totalorder %s3779_s30, %s3779_s30 }
 0x798   :  { %3619 = vtanh.f32 %v2505_v60 }
 0x799   :  { %3621 = vpow2.f32 %v3303_v38  ;;  %p3786_p9 = por %p3785_p8, %p3784_p7 }
 0x79b   :  { %p3787_p10 = pnand %p3786_p9, %p3780_p6 }
 0x7a0   :  { %v3616_v39 = vpop.eup %3615 }
 0x7a1   :  { %v2515_v29 = vadd.f32 1.0, %v3616_v39  ;;  %v3618_v22 = vpop.eup %3617 }
 0x7a2   :  { %v2516_v9 = vadd.f32 1.0, %v3618_v22  ;;  %v3620_v11 = vpop.eup %3619 }
 0x7a3   :  { %3623 = vrcp.f32 %v2515_v29  ;;  %v3622_v48 = vpop.eup %3621 }
 0x7a4   :  { %3625 = vrcp.f32 %v2516_v9  ;;  %v2517_v14 = vadd.f32 1.0, %v3622_v48 }
 0x7a6   :  { %3627 = vrcp.f32 %v2517_v14 }
 0x7ad   :  { %v3624_v12 = vpop.eup %3623 }
 0x7ae   :  { %v2526_v41 = vmul.f32 %v3624_v12, %v3620_v11  ;;  %v3626_v42 = vpop.eup %3625 }
 0x7af   :  { %v2525_v44 = vmul.f32 %v3626_v42, %v4545_v28 }
 0x7b0   :  { %v3628_v43 = vpop.eup %3627 }
 0x7b1   :  { %v4583_v46 = vadd.f32 %v2526_v41, %v2525_v44 }
 0x7b3   :  { %3629 = vtanh.f32 %v4583_v46 }
 0x7bd   :  { %v3630_v15 = vpop.eup %3629 }
 0x7be   :  { %v4586_v47 = vmul.f32 %v3630_v15, %v3628_v43 }
 0x7c0   :  { %v2537_v45 = vpack.c.bf16 %v4586_v47, %v4586_v47 }
 0x7c2   :  { %2763 = vmatmul.mubr.bf16.vlgmr.msra.gmra.mrb[40].mxu0 %v2537_v45  ;;  %2804 = vmatmul.mubr.bf16.vlgmr.msra.gmra.mrb[48].mxu1 %v2537_v45 }
 0x7c3   :  { %3361 = vmatpush3.bf16.msra.mxu0 %v3511_v61  ;;  %3376 = vmatprep.mubr.bf16.mxu0 %v2852_v10 }
 0x7c4   :  { %3362 = vmatprep.subr.bf16.mxu0 %v3512_v49 }
 0x7c7   :  { %3363 = vmatpush3.bf16.msra.mxu0 %v3512_v49 }
 0x7c8   :  { %3364 = vmatprep.subr.bf16.mxu0 %v3513_v27 }
 0x7cb   :  { %3365 = vmatpush3.bf16.msra.mxu0 %v3513_v27 }
 0x7cc   :  { %3366 = vmatprep.subr.bf16.mxu0 %v3514_v5 }
 0x7cf   :  { %3367 = vmatpush3.bf16.msra.mxu0 %v3514_v5 }
 0x7d0   :  { %3368 = vmatprep.subr.bf16.mxu0 %v3515_v31 }
 0x7d3   :  { %3369 = vmatpush3.bf16.msra.mxu0 %v3515_v31 }
 0x7d4   :  { %3370 = vmatprep.subr.bf16.mxu0 %v3516_v54 }
 0x7d7   :  { %3371 = vmatpush3.bf16.msra.mxu0 %v3516_v54 }
 0x7d8   :  { %3372 = vmatprep.subr.bf16.mxu0 %v3517_v2 }
 0x7db   :  { %3373 = vmatpush3.bf16.msra.mxu0 %v3517_v2 }
 0x7dc   :  { %3374 = vmatprep.subr.bf16.mxu0 %v3518_v1 }
 0x7df   :  { %3375 = vmatpush3.bf16.msra.mxu0 %v3518_v1 }
 0x7e2   :  { %3377 = vmatmul.mubr.bf16.vlgmr.msra.gmra.mrb[44].mxu0 %v2853_v52 }
 0x7e3   :  { %3380 = vmatprep.mubr.bf16.mxu0 %v2854_v4 }
 0x895   :  { %v2764_v18 = vpop.f32.mrb[40].mxu0  ;;  %v2805_v25 = vpop.f32.mrb[48].mxu1 }
 0x896   :  { %v2812_v17 = vadd.f32 %v2764_v18, %v4698_v30  ;;  %v2814_v19 = vadd.f32 %v2805_v25, %v4699_v58  ;;  %v2766_v28 = vpop.f32.mrb[41].mxu0  ;;  %v2807_v20 = vpop.f32.mrb[49].mxu1 }
 0x897   :  { %v2813_v8 = vadd.f32 %v2766_v28, %v4700_v40  ;;  %v2815_v7 = vadd.f32 %v2807_v20, %v4701_v26  ;;  %v2768_v34 = vpop.f32.mrb[42].mxu0  ;;  %v2809_v0 = vpop.f32.mrb[50].mxu1 }
 0x898   :  { %v3336_v32 = vmul.f32 -1.442695, %v2812_v17  ;;  %v2769_v50 = vpop.f32.mrb[43].mxu0  ;;  %v2810_v3 = vpop.f32.mrb[51].mxu1  ;;  %v3338_v6 = vmul.f32 -1.442695, %v2814_v19 }
 0x899   :  { %v3337_v33 = vmul.f32 -1.442695, %v2813_v8 }
 0x89a   :  { %3631 = vpow2.f32 %v3336_v32 }
 0x89b   :  { %3633 = vpow2.f32 %v3337_v33 }
 0x89c   :  { %3635 = vtanh.f32 %v2815_v7 }
 0x89d   :  { %3637 = vpow2.f32 %v3338_v6 }
 0x8a4   :  { %v3632_v51 = vpop.eup %3631 }
 0x8a5   :  { %v2825_v61 = vadd.f32 1.0, %v3632_v51  ;;  %v3634_v62 = vpop.eup %3633 }
 0x8a6   :  { %v2826_v55 = vadd.f32 1.0, %v3634_v62  ;;  %v3636_v63 = vpop.eup %3635 }
 0x8a7   :  { %3639 = vrcp.f32 %v2825_v61  ;;  %v3638_v36 = vpop.eup %3637 }
 0x8a8   :  { %3641 = vrcp.f32 %v2826_v55  ;;  %v2827_v13 = vadd.f32 1.0, %v3638_v36 }
 0x8aa   :  { %3643 = vrcp.f32 %v2827_v13 }
 0x8b1   :  { %v3640_v53 = vpop.eup %3639 }
 0x8b2   :  { %v2836_v56 = vmul.f32 %v3640_v53, %v3636_v63  ;;  %v3642_v57 = vpop.eup %3641 }
 0x8b3   :  { %v2835_v60 = vmul.f32 %v3642_v57, %v4583_v46 }
 0x8b4   :  { %v3644_v22 = vpop.eup %3643 }
 0x8b5   :  { %v3378_v24 = vpop.f32.mrb[44].mxu0  ;;  %v2837_v16 = vadd.f32 %v2836_v56, %v2835_v60 }
 0x8b6   :  { %v2970_v21 = vadd.f32 %v3378_v24, %v4603_v59  ;;  %v2961_v23 = vpop.f32.mrb[45].mxu0 }
 0x8b7   :  { %v2962_v35 = vadd.f32 %v4603_v59, %v2961_v23  ;;  %v3379_v37 = vpop.f32.mrb[46].mxu0  ;;  %3645 = vtanh.f32 %v2837_v16  ;;  %2843 = vst [vmem:[#allocation18] sm:$0xff] %v2837_v16 }
 0x8b8   :  { %2994 = vst [vmem:[#allocation15 + $0x10] sm:$0xff] %v2970_v21  ;;  %v2973_v38 = vadd.f32 %v3379_v37, %v4603_v59  ;;  %v2964_v39 = vpop.f32.mrb[47].mxu0 }
 0x8b9   :  { %2992 = vst [vmem:[#allocation15] sm:$0xff] %v2962_v35  ;;  %v2965_v29 = vadd.f32 %v4603_v59, %v2964_v39 }
 0x8ba   :  { %2995 = vst [vmem:[#allocation15 + $0x18] sm:$0xff] %v2973_v38 }
 0x8bb   :  { %2993 = vst [vmem:[#allocation15 + $0x8] sm:$0xff] %v2965_v29 }
 0x8c1   :  { %v3646_v9 = vpop.eup %3645 }
 0x8c2   :  { %v2839_v11 = vmul.f32 %v3646_v9, %v3644_v22 }
 0x8c4   :  { %v2855_v48 = vpack.c.bf16 %v2839_v11, %v4586_v47  ;;  %2842 = vst [vmem:[#allocation16] sm:$0xff] %v2839_v11 }
 0x8c6   :  { %3381 = vmatmul.mubr.bf16.gmra.mrb[48].mxu0 %v2855_v48 }
 0x8c7   :  { %3790 = shalt.err (!%p3787_p10)
}
 0x8c8   :  { %s3791_s17 = scalar_lea.hbm %s4663_s9, 128 }
 0x8c9   :  { %p3792_p11 = scmp.ne.s32.totalorder %s4663_s9, %s3791_s17  ;;  %p3795_p12 = scmp.lt.u32.totalorder %s3791_s17, %s4663_s9 }
 0x8cb   :  { %p3797_p13 = pnand %p3795_p12, %p3792_p11 }
 0x8cd   :  { %3800 = shalt.err (!%p3797_p13)
}
 0x8ce   :  { %3021 = dma.vmem_to_hbm [thread:$0]  %s3019_s29, 128, %s4663_s9, [#allocation17]  }
 0x8cf   :  { %s3871_s23 = smov [#allocation18]  }
 0x8d0   :  { %s3028_s24 = sshll.u32 %s3871_s23, 4  ;;  %s3029_s24 = int_to_ptr.vmem [resolvable:$true] %s3028_s24 }
 0x8d1   :  { %s3801_s0 = scalar_lea.vmem %s3029_s24, 128  ;;  %p3806_p1 = scmp.lt.s32.totalorder %s3029_s24, %s3029_s24 }
 0x8d2   :  { %p3802_p0 = scmp.ne.s32.totalorder %s3029_s24, %s3801_s0  ;;  %p3807_p2 = scmp.lt.s32.totalorder %s3801_s0, %s3801_s0 }
 0x8d4   :  { %p3808_p3 = por %p3807_p2, %p3806_p1 }
 0x8d6   :  { %p3809_p4 = pnand %p3808_p3, %p3802_p0 }
 0x8d8   :  { %3812 = shalt.err (!%p3809_p4)
}
 0x8d9   :  { %s3813_s26 = scalar_lea.hbm %s4664_s10, 128 }
 0x8da   :  { %p3814_p5 = scmp.ne.s32.totalorder %s4664_s10, %s3813_s26  ;;  %p3817_p6 = scmp.lt.u32.totalorder %s3813_s26, %s4664_s10 }
 0x8dc   :  { %p3819_p7 = pnand %p3817_p6, %p3814_p5 }
 0x8de   :  { %3822 = shalt.err (!%p3819_p7)
}
 0x8df   :  { %3031 = dma.vmem_to_hbm [thread:$0]  %s3029_s24, 128, %s4664_s10, [#allocation17]  }
 0x8e0   :  { %s3872_s27 = smov [#allocation15]  }
 0x8e1   :  { %s3005_s5 = sshll.u32 %s3872_s27, 4  ;;  %s3006_s5 = int_to_ptr.vmem [resolvable:$true] %s3005_s5 }
 0x8e2   :  { %s3823_s10 = scalar_lea.vmem %s3006_s5, 1024  ;;  %p3828_p9 = scmp.lt.s32.totalorder %s3006_s5, %s3006_s5 }
 0x8e3   :  { %p3824_p8 = scmp.ne.s32.totalorder %s3006_s5, %s3823_s10  ;;  %p3829_p10 = scmp.lt.s32.totalorder %s3823_s10, %s3823_s10 }
 0x8e5   :  { %p3830_p11 = por %p3829_p10, %p3828_p9 }
 0x8e7   :  { %p3831_p12 = pnand %p3830_p11, %p3824_p8 }
 0x999   :  { %v3382_v12 = vpop.f32.mrb[48].mxu0 }
 0x99a   :  { %v2986_v41 = vadd.f32 %v3382_v12, %v4603_v59  ;;  %v2977_v42 = vpop.f32.mrb[49].mxu0 }
 0x99b   :  { %v2978_v14 = vadd.f32 %v4603_v59, %v2977_v42  ;;  %v3383_v44 = vpop.f32.mrb[50].mxu0 }
 0x99c   :  { %2998 = vst [vmem:[#allocation15 + $0x30] sm:$0xff] %v2986_v41  ;;  %v2989_v46 = vadd.f32 %v3383_v44, %v4603_v59  ;;  %v2980_v43 = vpop.f32.mrb[51].mxu0 }
 0x99d   :  { %2996 = vst [vmem:[#allocation15 + $0x20] sm:$0xff] %v2978_v14  ;;  %v2981_v15 = vadd.f32 %v4603_v59, %v2980_v43 }
 0x99e   :  { %2999 = vst [vmem:[#allocation15 + $0x38] sm:$0xff] %v2989_v46 }
 0x99f   :  { %2997 = vst [vmem:[#allocation15 + $0x28] sm:$0xff] %v2981_v15 }
 0x9a0   :  { %3834 = shalt.err (!%p3831_p12)
}
 0x9a1   :  { %s3835_s29 = scalar_lea.hbm %s4662_s8, 1024 }
 0x9a2   :  { %p3836_p13 = scmp.ne.s32.totalorder %s4662_s8, %s3835_s29  ;;  %p3839_p0 = scmp.lt.u32.totalorder %s3835_s29, %s4662_s8 }
 0x9a4   :  { %p3841_p1 = pnand %p3839_p0, %p3836_p13 }
 0x9a6   :  { %3844 = shalt.err (!%p3841_p1)
}
 0x9a7   :  { %3011 = dma.vmem_to_hbm [thread:$0]  %s3006_s5, 1024, %s4662_s8, [#allocation6], %s3862_s3, %s3862_s3, %s3863_s16  }
 0x9a8   :  { %3853 = dma.done.wait [#allocation6], 1024  }
 0x9a9   :  { %3854 = vsyncadd [#allocation6], 4294966272 }
 0x9aa   :  { %3855 = dma.done.wait [#allocation17], 256  }
 0x9ab   :  { %3856 = vsyncadd [#allocation17], 4294967040 }
 0x9ac   :  { %3041 = vsyncpa [#allocation5], 1 }
 0x9ad   :  { %3042 = vsyncpa [#allocation8], 1 }
 0x9ae   :  { %3043 = vsyncpa [#allocation11], 1 }
 0x9af   :  { %3044 = vsyncpa [#allocation14], 1 }
 0x9b0   :  { %3045 = vsyncpa [#allocation6], 1 }
 0x9b1   :  { %3046 = vsyncpa [#allocation17], 1 }

</bundles_post_ra>
